<compile_context>
chip_gen: v6e
topology: v6e:2x2x1
jax: 0.10.0
libtpu: 0.0.40
codegen_flags: <defaults>
</compile_context>

<pallas_src>
import functools

import jax
import jax.numpy as jnp
import numpy as np
from jax.experimental import pallas as pl
from jax.experimental.pallas import tpu as pltpu

IN_EPS = 1e-5       # InstanceNorm3d default eps
BN_EPS = 1e-5       # BatchNorm3d default eps
NEG_SLOPE = 0.01    # LeakyReLU default negative slope


def _instance_norm(t, inv_s):
    # One-pass statistics: both reductions read the same tile, var = E[x^2] - mean^2.
    # (f32 cancellation is negligible for a few-hundred-element reduction of O(1)
    #  activations; eps=1e-5 also guards a slightly-negative variance.)
    mean = jnp.sum(t, axis=1, keepdims=True) * inv_s
    ex2 = jnp.sum(t * t, axis=1, keepdims=True) * inv_s
    var = ex2 - mean * mean
    return (t - mean) * jax.lax.rsqrt(var + IN_EPS)


def dec_attn_fusion_kernel(x_ref, w1_ref, w2_ref,
                           fc1wT_ref, fc1b_ref, fc2w_ref, fc2b_ref,
                           t3d_ref, wc_ref, bc_ref,
                           out_ref, *, inv_s):
    """Whole DecAttnFusion forward for one batch element, layout (C, S=D*H*W)."""
    x = x_ref[0]                                                       # (C, S) f32

    # ---- ScaleAttn.convBlock: 1x1x1 conv -> IN -> LeakyReLU -> 1x1x1 conv -> IN
    # (conv biases are a no-op under InstanceNorm and are dropped in the wrapper)
    y = jnp.dot(w1_ref[...], x, preferred_element_type=jnp.float32)
    y = _instance_norm(y, inv_s)
    y = jnp.maximum(y, NEG_SLOPE * y)                                  # LeakyReLU
    y = jnp.dot(w2_ref[...], y, preferred_element_type=jnp.float32)
    y = _instance_norm(y, inv_s)

    # ---- ChannelAttention: shared MLP on avg & max pools, all on the VPU/XLU.
    # fc(avg)+fc(max) = fc2 @ (relu(fc1@avg + b1) + relu(fc1@max + b1)) + 2*b2
    avg = jnp.mean(y, axis=1, keepdims=True)                           # (C, 1)
    mx = jnp.max(y, axis=1, keepdims=True)                             # (C, 1)
    h_a = jnp.sum(fc1wT_ref[...] * avg, axis=0, keepdims=True) + fc1b_ref[...]   # (1, C4)
    h_m = jnp.sum(fc1wT_ref[...] * mx, axis=0, keepdims=True) + fc1b_ref[...]    # (1, C4)
    h = jnp.maximum(h_a, 0.0) + jnp.maximum(h_m, 0.0)                  # (1, C4)
    q = jnp.sum(fc2w_ref[...] * h, axis=1, keepdims=True) + 2.0 * fc2b_ref[...]  # (C, 1)
    y = jax.nn.sigmoid(q) * y                                          # ca(x) * x

    # ---- SpatialAttention 7x7x7 conv as ONE bf16 MXU matmul against the precomputed
    # 3D block-Toeplitz weight (rows = (c, d, h, w) input taps, cols = output voxels).
    avg_c = jnp.mean(y, axis=0, keepdims=True)                         # (1, S)
    max_c = jnp.max(y, axis=0, keepdims=True)                          # (1, S)
    pooled = jnp.concatenate([avg_c, max_c], axis=1).astype(jnp.bfloat16)   # (1, 2S)
    conv = jnp.dot(pooled, t3d_ref[...], preferred_element_type=jnp.float32)  # (1, S)
    sa = jax.nn.sigmoid(conv)

    # ---- ScaleAttn residual + DecAttnFusion residual + ReLU
    z = jnp.maximum(sa * y + 2.0 * x, 0.0)

    # ---- 1x1x1 conv (in_c -> out_c) with BatchNorm3d (eval) folded into w/b, then ReLU
    o = jnp.dot(wc_ref[...], z, preferred_element_type=jnp.float32) + bc_ref[...]
    out_ref[0] = jnp.maximum(o, 0.0)


def _build_spatial_toeplitz_3d(wsa, D, H, W):
    """Fold ALL taps (kd, kh, kw) of the 7^3 SpatialAttention conv into one block-Toeplitz
    matrix of shape (2*S, S): rows indexed (c, ds, hs, ws), cols (do, ho, wo).
    Pure, batch-independent weight prep done once on the host."""
    k = wsa.shape[-1]
    pad = k // 2
    S = D * H * W
    ds = np.arange(D)[:, None, None, None, None, None]
    hs = np.arange(H)[None, :, None, None, None, None]
    ws = np.arange(W)[None, None, :, None, None, None]
    do = np.arange(D)[None, None, None, :, None, None]
    ho = np.arange(H)[None, None, None, None, :, None]
    wo = np.arange(W)[None, None, None, None, None, :]
    kd = ds - do + pad
    kh = hs - ho + pad
    kw = ws - wo + pad
    valid = (kd >= 0) & (kd < k) & (kh >= 0) & (kh < k) & (kw >= 0) & (kw < k)
    kdc = np.clip(kd, 0, k - 1)
    khc = np.clip(kh, 0, k - 1)
    kwc = np.clip(kw, 0, k - 1)
    w = np.asarray(wsa[0], dtype=np.float32)                 # (2, k, k, k)
    t = w[:, kdc, khc, kwc] * valid                          # (2, D, H, W, D, H, W)
    return jnp.asarray(t.reshape(2 * S, S))


def dec_attn_fusion_forward(x, params):
    N, C, D, H, W = x.shape
    S = D * H * W
    x2 = x.reshape(N, C, S).astype(jnp.float32)

    w1 = params["w1"].astype(jnp.float32)
    w2 = params["w2"].astype(jnp.float32)
    fc1wT = params["fc1w"].T.astype(jnp.float32)                    # (C, C4)
    fc1b = params["fc1b"].reshape(1, -1).astype(jnp.float32)        # (1, C4)
    fc2w = params["fc2w"].astype(jnp.float32)                       # (C, C4)
    fc2b = params["fc2b"].reshape(-1, 1).astype(jnp.float32)        # (C, 1)
    wsa = params["wsa"]
    wc, bc = params["wc"], params["bc"]
    gamma, beta = params["bn_gamma"], params["bn_beta"]
    rm, rv = params["bn_mean"], params["bn_var"]

    C4 = fc1wT.shape[1]
    OC = wc.shape[0]

    # Full 3D block-Toeplitz spatial-attention weight, bf16 (S=512 -> 1 MiB in VMEM).
    assert 2 * S * S * 2 <= 16 * 1024 * 1024, (
        "monolithic Toeplitz too large; use per-kd tap accumulation for big volumes")
    t3d = _build_spatial_toeplitz_3d(wsa, D, H, W).astype(jnp.bfloat16)   # (2S, S)

    # Fold eval-mode BatchNorm3d into the final 1x1x1 conv: wc' = s*wc, bc' = s*bc + shift.
    inv_std = gamma / jnp.sqrt(rv + BN_EPS)                         # (OC,)
    bn_shift = beta - rm * inv_std                                  # (OC,)
    wc_f = (wc * inv_std[:, None]).astype(jnp.float32)              # (OC, C)
    bc_f = (bc * inv_std + bn_shift).reshape(OC, 1).astype(jnp.float32)

    def full(shape):
        nd = len(shape)
        return pl.BlockSpec(shape, lambda n, _nd=nd: (0,) * _nd)

    def per_batch(shape):
        nd = len(shape)
        return pl.BlockSpec((1,) + shape, lambda n, _nd=nd: (n,) + (0,) * _nd)

    kernel = functools.partial(dec_attn_fusion_kernel, inv_s=1.0 / float(S))

    out = pl.pallas_call(
        kernel,
        grid=(N,),
        in_specs=[per_batch((C, S)),
                  full((C, C)), full((C, C)),
                  full((C, C4)), full((1, C4)),
                  full((C, C4)), full((C, 1)),
                  full((2 * S, S)),
                  full((OC, C)), full((OC, 1))],
        out_specs=per_batch((OC, S)),
        out_shape=jax.ShapeDtypeStruct((N, OC, S), jnp.float32),
        compiler_params=pltpu.CompilerParams(
            dimension_semantics=("parallel",),
            vmem_limit_bytes=32 * 1024 * 1024),
    )(x2, w1, w2, fc1wT, fc1b, fc2w, fc2b, t3d, wc_f, bc_f)

    return out.reshape(N, OC, D, H, W)


def reference(x, params):
    """Pure-JAX reference matching the PyTorch DecAttnFusion forward (BN in eval mode)."""
    w1, b1 = params["w1"], params["b1"]
    w2, b2 = params["w2"], params["b2"]
    fc1w, fc1b = params["fc1w"], params["fc1b"]
    fc2w, fc2b = params["fc2w"], params["fc2b"]
    wsa = params["wsa"]
    wc, bc = params["wc"], params["bc"]
    gamma, beta = params["bn_gamma"], params["bn_beta"]
    rm, rv = params["bn_mean"], params["bn_var"]

    def conv1x1(t, w, b):
        return jnp.einsum('oc,ncdhw->nodhw', w, t) + b[None, :, None, None, None]

    def inorm(t):
        m = t.mean(axis=(2, 3, 4), keepdims=True)
        v = ((t - m) ** 2).mean(axis=(2, 3, 4), keepdims=True)
        return (t - m) / jnp.sqrt(v + IN_EPS)

    # ScaleAttn.convBlock
    y = conv1x1(x, w1, b1)
    y = inorm(y)
    y = jnp.where(y > 0, y, NEG_SLOPE * y)
    y = conv1x1(y, w2, b2)
    y = inorm(y)

    # ChannelAttention
    avg = y.mean(axis=(2, 3, 4), keepdims=True)
    mx = y.max(axis=(2, 3, 4), keepdims=True)

    def fc(p):
        h = jnp.maximum(conv1x1(p, fc1w, fc1b), 0.0)
        return conv1x1(h, fc2w, fc2b)

    gate = jax.nn.sigmoid(fc(avg) + fc(mx))
    y = gate * y

    # SpatialAttention
    sp = jnp.concatenate([y.mean(axis=1, keepdims=True), y.max(axis=1, keepdims=True)], axis=1)
    conv = jax.lax.conv_general_dilated(sp, wsa, window_strides=(1, 1, 1),
                                        padding=[(3, 3), (3, 3), (3, 3)],
                                        dimension_numbers=('NCDHW', 'OIDHW', 'NCDHW'))
    attn = jax.nn.sigmoid(conv) * y + x          # ScaleAttn output

    # DecAttnFusion tail
    z = attn + x
    z = jnp.maximum(z, 0.0)
    o = conv1x1(z, wc, bc)
    o = (o - rm[None, :, None, None, None]) / jnp.sqrt(rv[None, :, None, None, None] + BN_EPS)
    o = o * gamma[None, :, None, None, None] + beta[None, :, None, None, None]
    return jnp.maximum(o, 0.0)


if __name__ == "__main__":
    key = jax.random.PRNGKey(0)
    N, C, OC = 2, 8, 16
    D, H, W = 4, 8, 16
    ratio = 4
    C4 = C // ratio
    ks = jax.random.split(key, 16)

    x = jax.random.normal(ks[0], (N, C, D, H, W), jnp.float32)
    params = dict(
        # convBlock 1x1x1 convs
        w1=0.3 * jax.random.normal(ks[1], (C, C), jnp.float32),
        b1=0.1 * jax.random.normal(ks[2], (C,), jnp.float32),
        w2=0.3 * jax.random.normal(ks[3], (C, C), jnp.float32),
        b2=0.1 * jax.random.normal(ks[4], (C,), jnp.float32),
        # ChannelAttention fc
        fc1w=0.3 * jax.random.normal(ks[5], (C4, C), jnp.float32),
        fc1b=0.1 * jax.random.normal(ks[6], (C4,), jnp.float32),
        fc2w=0.3 * jax.random.normal(ks[7], (C, C4), jnp.float32),
        fc2b=0.1 * jax.random.normal(ks[8], (C,), jnp.float32),
        # SpatialAttention Conv3d(2, 1, 7, padding=3, bias=False)
        wsa=0.05 * jax.random.normal(ks[9], (1, 2, 7, 7, 7), jnp.float32),
        # DecAttnFusion 1x1x1 conv + BatchNorm3d (inference-mode stats)
        wc=0.3 * jax.random.normal(ks[10], (OC, C), jnp.float32),
        bc=0.1 * jax.random.normal(ks[11], (OC,), jnp.float32),
        bn_gamma=1.0 + 0.1 * jax.random.normal(ks[12], (OC,), jnp.float32),
        bn_beta=0.1 * jax.random.normal(ks[13], (OC,), jnp.float32),
        bn_mean=0.1 * jax.random.normal(ks[14], (OC,), jnp.float32),
        bn_var=jax.random.uniform(ks[15], (OC,), jnp.float32, minval=0.5, maxval=1.5),
    )

    out = jax.block_until_ready(dec_attn_fusion_forward(x, params))
    ref = jax.block_until_ready(reference(x, params))
    assert out.shape == (N, OC, D, H, W)
    np.testing.assert_allclose(np.asarray(out), np.asarray(ref), atol=2e-2, rtol=2e-2)
    print("KERNEL_OK")
</pallas_src>

<mosaic_0001>
module attributes {stable_mosaic.version = 11 : i64} {
  func.func @dec_attn_fusion_kernel(%arg0: i32, %arg1: memref<1x8x512xf32, #tpu.memory_space<vmem>>, %arg2: memref<8x8xf32, #tpu.memory_space<vmem>>, %arg3: memref<8x8xf32, #tpu.memory_space<vmem>>, %arg4: memref<8x2xf32, #tpu.memory_space<vmem>>, %arg5: memref<1x2xf32, #tpu.memory_space<vmem>>, %arg6: memref<8x2xf32, #tpu.memory_space<vmem>>, %arg7: memref<8x1xf32, #tpu.memory_space<vmem>>, %arg8: memref<1024x512xbf16, #tpu.memory_space<vmem>>, %arg9: memref<16x8xf32, #tpu.memory_space<vmem>>, %arg10: memref<16x1xf32, #tpu.memory_space<vmem>>, %arg11: memref<1x16x512xf32, #tpu.memory_space<vmem>>) attributes {dimension_semantics = [#tpu.dimension_semantics<parallel>], iteration_bounds = array<i64: 2>, scalar_prefetch = 0 : i64, scratch_operands = 0 : i64, tpu.core_type = #tpu.core_type<tc>, window_params = [{transform_indices = @transform_0, window_bounds = array<i64: 1, 8, 512>}, {pipeline_mode = #tpu.pipeline_mode<synchronous>, transform_indices = @transform_1, window_bounds = array<i64: 8, 8>}, {pipeline_mode = #tpu.pipeline_mode<synchronous>, transform_indices = @transform_2, window_bounds = array<i64: 8, 8>}, {pipeline_mode = #tpu.pipeline_mode<synchronous>, transform_indices = @transform_3, window_bounds = array<i64: 8, 2>}, {pipeline_mode = #tpu.pipeline_mode<synchronous>, transform_indices = @transform_4, window_bounds = array<i64: 1, 2>}, {pipeline_mode = #tpu.pipeline_mode<synchronous>, transform_indices = @transform_5, window_bounds = array<i64: 8, 2>}, {pipeline_mode = #tpu.pipeline_mode<synchronous>, transform_indices = @transform_6, window_bounds = array<i64: 8, 1>}, {pipeline_mode = #tpu.pipeline_mode<synchronous>, transform_indices = @transform_7, window_bounds = array<i64: 1024, 512>}, {pipeline_mode = #tpu.pipeline_mode<synchronous>, transform_indices = @transform_8, window_bounds = array<i64: 16, 8>}, {pipeline_mode = #tpu.pipeline_mode<synchronous>, transform_indices = @transform_9, window_bounds = array<i64: 16, 1>}, {transform_indices = @transform_10, window_bounds = array<i64: 1, 16, 512>}]} {
    %c0 = arith.constant 0 : index
    %c0_0 = arith.constant 0 : index
    %c0_1 = arith.constant 0 : index
    %0 = vector.load %arg1[%c0, %c0_0, %c0_1] : memref<1x8x512xf32, #tpu.memory_space<vmem>>, vector<1x8x512xf32>
    %1 = vector.shape_cast %0 : vector<1x8x512xf32> to vector<8x512xf32>
    %c0_2 = arith.constant 0 : index
    %c0_3 = arith.constant 0 : index
    %2 = vector.load %arg2[%c0_2, %c0_3] : memref<8x8xf32, #tpu.memory_space<vmem>>, vector<8x8xf32>
    %cst = arith.constant dense<0.000000e+00> : vector<8x512xf32>
    %3 = tpu.matmul %2, %1, %cst {dimension_numbers = #tpu.dot_dimension_numbers<[1], [0], [0], [1], [0, 0, 1, 1], [], []>} : vector<8x8xf32>, vector<8x512xf32>, vector<8x512xf32> -> vector<8x512xf32>
    %cst_4 = arith.constant dense<0.000000e+00> : vector<8xf32>
    %4 = vector.multi_reduction <add>, %3, %cst_4 [1] : vector<8x512xf32> to vector<8xf32>
    %5 = vector.shape_cast %4 : vector<8xf32> to vector<8x1xf32>
    %cst_5 = arith.constant 0.001953125 : f32
    %6 = vector.broadcast %cst_5 : f32 to vector<8x1xf32>
    %7 = arith.mulf %5, %6 : vector<8x1xf32>
    %8 = arith.mulf %3, %3 : vector<8x512xf32>
    %cst_6 = arith.constant dense<0.000000e+00> : vector<8xf32>
    %9 = vector.multi_reduction <add>, %8, %cst_6 [1] : vector<8x512xf32> to vector<8xf32>
    %10 = vector.shape_cast %9 : vector<8xf32> to vector<8x1xf32>
    %cst_7 = arith.constant 0.001953125 : f32
    %11 = vector.broadcast %cst_7 : f32 to vector<8x1xf32>
    %12 = arith.mulf %10, %11 : vector<8x1xf32>
    %13 = arith.mulf %7, %7 : vector<8x1xf32>
    %14 = arith.subf %12, %13 : vector<8x1xf32>
    %15 = vector.broadcast %7 : vector<8x1xf32> to vector<8x512xf32>
    %16 = arith.subf %3, %15 : vector<8x512xf32>
    %cst_8 = arith.constant 9.99999974E-6 : f32
    %17 = vector.broadcast %cst_8 : f32 to vector<8x1xf32>
    %18 = arith.addf %14, %17 : vector<8x1xf32>
    %19 = math.rsqrt %18 : vector<8x1xf32>
    %20 = vector.broadcast %19 : vector<8x1xf32> to vector<8x512xf32>
    %21 = arith.mulf %16, %20 : vector<8x512xf32>
    %cst_9 = arith.constant 0.00999999977 : f32
    %22 = vector.broadcast %cst_9 : f32 to vector<8x512xf32>
    %23 = arith.mulf %22, %21 : vector<8x512xf32>
    %24 = arith.maximumf %21, %23 : vector<8x512xf32>
    %c0_10 = arith.constant 0 : index
    %c0_11 = arith.constant 0 : index
    %25 = vector.load %arg3[%c0_10, %c0_11] : memref<8x8xf32, #tpu.memory_space<vmem>>, vector<8x8xf32>
    %cst_12 = arith.constant dense<0.000000e+00> : vector<8x512xf32>
    %26 = tpu.matmul %25, %24, %cst_12 {dimension_numbers = #tpu.dot_dimension_numbers<[1], [0], [0], [1], [0, 0, 1, 1], [], []>} : vector<8x8xf32>, vector<8x512xf32>, vector<8x512xf32> -> vector<8x512xf32>
    %cst_13 = arith.constant dense<0.000000e+00> : vector<8xf32>
    %27 = vector.multi_reduction <add>, %26, %cst_13 [1] : vector<8x512xf32> to vector<8xf32>
    %28 = vector.shape_cast %27 : vector<8xf32> to vector<8x1xf32>
    %cst_14 = arith.constant 0.001953125 : f32
    %29 = vector.broadcast %cst_14 : f32 to vector<8x1xf32>
    %30 = arith.mulf %28, %29 : vector<8x1xf32>
    %31 = arith.mulf %26, %26 : vector<8x512xf32>
    %cst_15 = arith.constant dense<0.000000e+00> : vector<8xf32>
    %32 = vector.multi_reduction <add>, %31, %cst_15 [1] : vector<8x512xf32> to vector<8xf32>
    %33 = vector.shape_cast %32 : vector<8xf32> to vector<8x1xf32>
    %cst_16 = arith.constant 0.001953125 : f32
    %34 = vector.broadcast %cst_16 : f32 to vector<8x1xf32>
    %35 = arith.mulf %33, %34 : vector<8x1xf32>
    %36 = arith.mulf %30, %30 : vector<8x1xf32>
    %37 = arith.subf %35, %36 : vector<8x1xf32>
    %38 = vector.broadcast %30 : vector<8x1xf32> to vector<8x512xf32>
    %39 = arith.subf %26, %38 : vector<8x512xf32>
    %cst_17 = arith.constant 9.99999974E-6 : f32
    %40 = vector.broadcast %cst_17 : f32 to vector<8x1xf32>
    %41 = arith.addf %37, %40 : vector<8x1xf32>
    %42 = math.rsqrt %41 : vector<8x1xf32>
    %43 = vector.broadcast %42 : vector<8x1xf32> to vector<8x512xf32>
    %44 = arith.mulf %39, %43 : vector<8x512xf32>
    %cst_18 = arith.constant dense<0.000000e+00> : vector<8xf32>
    %45 = vector.multi_reduction <add>, %44, %cst_18 [1] : vector<8x512xf32> to vector<8xf32>
    %46 = vector.shape_cast %45 : vector<8xf32> to vector<8x1xf32>
    %cst_19 = arith.constant 5.120000e+02 : f32
    %47 = vector.broadcast %cst_19 : f32 to vector<8x1xf32>
    %48 = arith.divf %46, %47 : vector<8x1xf32>
    %cst_20 = arith.constant dense<0xFF800000> : vector<8xf32>
    %49 = vector.multi_reduction <maximumf>, %44, %cst_20 [1] : vector<8x512xf32> to vector<8xf32>
    %50 = vector.shape_cast %49 : vector<8xf32> to vector<8x1xf32>
    %c0_21 = arith.constant 0 : index
    %c0_22 = arith.constant 0 : index
    %51 = vector.load %arg4[%c0_21, %c0_22] : memref<8x2xf32, #tpu.memory_space<vmem>>, vector<8x2xf32>
    %52 = vector.broadcast %48 : vector<8x1xf32> to vector<8x2xf32>
    %53 = arith.mulf %51, %52 : vector<8x2xf32>
    %cst_23 = arith.constant dense<0.000000e+00> : vector<2xf32>
    %54 = vector.multi_reduction <add>, %53, %cst_23 [0] : vector<8x2xf32> to vector<2xf32>
    %55 = vector.shape_cast %54 : vector<2xf32> to vector<1x2xf32>
    %c0_24 = arith.constant 0 : index
    %c0_25 = arith.constant 0 : index
    %56 = vector.load %arg5[%c0_24, %c0_25] : memref<1x2xf32, #tpu.memory_space<vmem>>, vector<1x2xf32>
    %57 = arith.addf %55, %56 : vector<1x2xf32>
    %c0_26 = arith.constant 0 : index
    %c0_27 = arith.constant 0 : index
    %58 = vector.load %arg4[%c0_26, %c0_27] : memref<8x2xf32, #tpu.memory_space<vmem>>, vector<8x2xf32>
    %59 = vector.broadcast %50 : vector<8x1xf32> to vector<8x2xf32>
    %60 = arith.mulf %58, %59 : vector<8x2xf32>
    %cst_28 = arith.constant dense<0.000000e+00> : vector<2xf32>
    %61 = vector.multi_reduction <add>, %60, %cst_28 [0] : vector<8x2xf32> to vector<2xf32>
    %62 = vector.shape_cast %61 : vector<2xf32> to vector<1x2xf32>
    %c0_29 = arith.constant 0 : index
    %c0_30 = arith.constant 0 : index
    %63 = vector.load %arg5[%c0_29, %c0_30] : memref<1x2xf32, #tpu.memory_space<vmem>>, vector<1x2xf32>
    %64 = arith.addf %62, %63 : vector<1x2xf32>
    %cst_31 = arith.constant 0.000000e+00 : f32
    %65 = vector.broadcast %cst_31 : f32 to vector<1x2xf32>
    %66 = arith.maximumf %57, %65 : vector<1x2xf32>
    %cst_32 = arith.constant 0.000000e+00 : f32
    %67 = vector.broadcast %cst_32 : f32 to vector<1x2xf32>
    %68 = arith.maximumf %64, %67 : vector<1x2xf32>
    %69 = arith.addf %66, %68 : vector<1x2xf32>
    %c0_33 = arith.constant 0 : index
    %c0_34 = arith.constant 0 : index
    %70 = vector.load %arg6[%c0_33, %c0_34] : memref<8x2xf32, #tpu.memory_space<vmem>>, vector<8x2xf32>
    %71 = vector.broadcast %69 : vector<1x2xf32> to vector<8x2xf32>
    %72 = arith.mulf %70, %71 : vector<8x2xf32>
    %cst_35 = arith.constant dense<0.000000e+00> : vector<8xf32>
    %73 = vector.multi_reduction <add>, %72, %cst_35 [1] : vector<8x2xf32> to vector<8xf32>
    %74 = vector.shape_cast %73 : vector<8xf32> to vector<8x1xf32>
    %c0_36 = arith.constant 0 : index
    %c0_37 = arith.constant 0 : index
    %75 = vector.load %arg7[%c0_36, %c0_37] : memref<8x1xf32, #tpu.memory_space<vmem>>, vector<8x1xf32>
    %cst_38 = arith.constant 2.000000e+00 : f32
    %76 = vector.broadcast %cst_38 : f32 to vector<8x1xf32>
    %77 = arith.mulf %76, %75 : vector<8x1xf32>
    %78 = arith.addf %74, %77 : vector<8x1xf32>
    %79 = arith.negf %78 : vector<8x1xf32>
    %80 = math.exp %79 : vector<8x1xf32>
    %cst_39 = arith.constant 1.000000e+00 : f32
    %81 = vector.broadcast %cst_39 : f32 to vector<8x1xf32>
    %82 = arith.addf %81, %80 : vector<8x1xf32>
    %83 = arith.divf %81, %82 : vector<8x1xf32>
    %84 = vector.broadcast %83 : vector<8x1xf32> to vector<8x512xf32>
    %85 = arith.mulf %84, %44 : vector<8x512xf32>
    %cst_40 = arith.constant dense<0.000000e+00> : vector<512xf32>
    %86 = vector.multi_reduction <add>, %85, %cst_40 [0] : vector<8x512xf32> to vector<512xf32>
    %87 = vector.shape_cast %86 : vector<512xf32> to vector<1x512xf32>
    %cst_41 = arith.constant 8.000000e+00 : f32
    %88 = vector.broadcast %cst_41 : f32 to vector<1x512xf32>
    %89 = arith.divf %87, %88 : vector<1x512xf32>
    %cst_42 = arith.constant dense<0xFF800000> : vector<512xf32>
    %90 = vector.multi_reduction <maximumf>, %85, %cst_42 [0] : vector<8x512xf32> to vector<512xf32>
    %91 = vector.shape_cast %90 : vector<512xf32> to vector<1x512xf32>
    %92 = tpu.concatenate %89, %91 in 1 : vector<1x512xf32>, vector<1x512xf32> -> vector<1x1024xf32>
    %93 = arith.truncf %92 : vector<1x1024xf32> to vector<1x1024xbf16>
    %c0_43 = arith.constant 0 : index
    %c0_44 = arith.constant 0 : index
    %94 = vector.load %arg8[%c0_43, %c0_44] : memref<1024x512xbf16, #tpu.memory_space<vmem>>, vector<1024x512xbf16>
    %cst_45 = arith.constant dense<0.000000e+00> : vector<1x512xf32>
    %95 = tpu.matmul %93, %94, %cst_45 {dimension_numbers = #tpu.dot_dimension_numbers<[1], [0], [0], [1], [0, 0, 1, 1], [], []>} : vector<1x1024xbf16>, vector<1024x512xbf16>, vector<1x512xf32> -> vector<1x512xf32>
    %96 = arith.negf %95 : vector<1x512xf32>
    %97 = math.exp %96 : vector<1x512xf32>
    %cst_46 = arith.constant 1.000000e+00 : f32
    %98 = vector.broadcast %cst_46 : f32 to vector<1x512xf32>
    %99 = arith.addf %98, %97 : vector<1x512xf32>
    %100 = arith.divf %98, %99 : vector<1x512xf32>
    %101 = vector.broadcast %100 : vector<1x512xf32> to vector<8x512xf32>
    %102 = arith.mulf %101, %85 : vector<8x512xf32>
    %cst_47 = arith.constant 2.000000e+00 : f32
    %103 = vector.broadcast %cst_47 : f32 to vector<8x512xf32>
    %104 = arith.mulf %103, %1 : vector<8x512xf32>
    %105 = arith.addf %102, %104 : vector<8x512xf32>
    %cst_48 = arith.constant 0.000000e+00 : f32
    %106 = vector.broadcast %cst_48 : f32 to vector<8x512xf32>
    %107 = arith.maximumf %105, %106 : vector<8x512xf32>
    %c0_49 = arith.constant 0 : index
    %c0_50 = arith.constant 0 : index
    %108 = vector.load %arg9[%c0_49, %c0_50] : memref<16x8xf32, #tpu.memory_space<vmem>>, vector<16x8xf32>
    %cst_51 = arith.constant dense<0.000000e+00> : vector<16x512xf32>
    %109 = tpu.matmul %108, %107, %cst_51 {dimension_numbers = #tpu.dot_dimension_numbers<[1], [0], [0], [1], [0, 0, 1, 1], [], []>} : vector<16x8xf32>, vector<8x512xf32>, vector<16x512xf32> -> vector<16x512xf32>
    %c0_52 = arith.constant 0 : index
    %c0_53 = arith.constant 0 : index
    %110 = vector.load %arg10[%c0_52, %c0_53] : memref<16x1xf32, #tpu.memory_space<vmem>>, vector<16x1xf32>
    %111 = vector.broadcast %110 : vector<16x1xf32> to vector<16x512xf32>
    %112 = arith.addf %109, %111 : vector<16x512xf32>
    %cst_54 = arith.constant 0.000000e+00 : f32
    %113 = vector.broadcast %cst_54 : f32 to vector<16x512xf32>
    %114 = arith.maximumf %112, %113 : vector<16x512xf32>
    %c0_55 = arith.constant 0 : index
    %c0_56 = arith.constant 0 : index
    %c0_57 = arith.constant 0 : index
    %115 = vector.load %arg11[%c0_55, %c0_56, %c0_57] : memref<1x16x512xf32, #tpu.memory_space<vmem>>, vector<1x16x512xf32>
    %116 = vector.shape_cast %115 : vector<1x16x512xf32> to vector<16x512xf32>
    %117 = vector.shape_cast %114 : vector<16x512xf32> to vector<1x16x512xf32>
    tpu.vector_store %arg11[%c0_55, %c0_56, %c0_57], %117 {strides = array<i32>} : memref<1x16x512xf32, #tpu.memory_space<vmem>>, vector<1x16x512xf32>,
    return
  }
  func.func @transform_0(%arg0: i32) -> (i32, i32, i32) {
    %c0_i32 = arith.constant 0 : i32
    %c0_i32_0 = arith.constant 0 : i32
    %c0_i32_1 = arith.constant 0 : i32
    return %arg0, %c0_i32, %c0_i32_0 : i32, i32, i32
  }
  func.func @transform_1(%arg0: i32) -> (i32, i32) {
    %c0_i32 = arith.constant 0 : i32
    %c0_i32_0 = arith.constant 0 : i32
    %c0_i32_1 = arith.constant 0 : i32
    return %c0_i32, %c0_i32_0 : i32, i32
  }
  func.func @transform_2(%arg0: i32) -> (i32, i32) {
    %c0_i32 = arith.constant 0 : i32
    %c0_i32_0 = arith.constant 0 : i32
    %c0_i32_1 = arith.constant 0 : i32
    return %c0_i32, %c0_i32_0 : i32, i32
  }
  func.func @transform_3(%arg0: i32) -> (i32, i32) {
    %c0_i32 = arith.constant 0 : i32
    %c0_i32_0 = arith.constant 0 : i32
    %c0_i32_1 = arith.constant 0 : i32
    return %c0_i32, %c0_i32_0 : i32, i32
  }
  func.func @transform_4(%arg0: i32) -> (i32, i32) {
    %c0_i32 = arith.constant 0 : i32
    %c0_i32_0 = arith.constant 0 : i32
    %c0_i32_1 = arith.constant 0 : i32
    return %c0_i32, %c0_i32_0 : i32, i32
  }
  func.func @transform_5(%arg0: i32) -> (i32, i32) {
    %c0_i32 = arith.constant 0 : i32
    %c0_i32_0 = arith.constant 0 : i32
    %c0_i32_1 = arith.constant 0 : i32
    return %c0_i32, %c0_i32_0 : i32, i32
  }
  func.func @transform_6(%arg0: i32) -> (i32, i32) {
    %c0_i32 = arith.constant 0 : i32
    %c0_i32_0 = arith.constant 0 : i32
    %c0_i32_1 = arith.constant 0 : i32
    return %c0_i32, %c0_i32_0 : i32, i32
  }
  func.func @transform_7(%arg0: i32) -> (i32, i32) {
    %c0_i32 = arith.constant 0 : i32
    %c0_i32_0 = arith.constant 0 : i32
    %c0_i32_1 = arith.constant 0 : i32
    return %c0_i32, %c0_i32_0 : i32, i32
  }
  func.func @transform_8(%arg0: i32) -> (i32, i32) {
    %c0_i32 = arith.constant 0 : i32
    %c0_i32_0 = arith.constant 0 : i32
    %c0_i32_1 = arith.constant 0 : i32
    return %c0_i32, %c0_i32_0 : i32, i32
  }
  func.func @transform_9(%arg0: i32) -> (i32, i32) {
    %c0_i32 = arith.constant 0 : i32
    %c0_i32_0 = arith.constant 0 : i32
    %c0_i32_1 = arith.constant 0 : i32
    return %c0_i32, %c0_i32_0 : i32, i32
  }
  func.func @transform_10(%arg0: i32) -> (i32, i32, i32) {
    %c0_i32 = arith.constant 0 : i32
    %c0_i32_0 = arith.constant 0 : i32
    %c0_i32_1 = arith.constant 0 : i32
    return %arg0, %c0_i32, %c0_i32_0 : i32, i32, i32
  }
}

</mosaic_0001>

<bundles_post_ra>
// kernel: tpu_custom_call.1
= control target key start
LH: loop header
LB: loop body
LE: loop exit
PB: predicated region body
PF: predicated region fallthrough
CT: control target
= control target key end

     0   :  { %15 = vsyncpa [#allocation3], 0  ;;  %s4398_s0 = inlined_call_operand.vmem [shape: f32[2,8,512], index: 0, kind: input, shape index: {}]   ;;  %s4399_s1 = inlined_call_operand.hbm [shape: f32[8,8], index: 1, kind: input, shape index: {}]   ;;  %s4400_s2 = inlined_call_operand.hbm [shape: f32[8,8], index: 2, kind: input, shape index: {}]   ;;  %s4401_s3 = inlined_call_operand.vmem [shape: f32[8,2], index: 3, kind: input, shape index: {}]   ;;  %s4402_s4 = inlined_call_operand.vmem [shape: f32[1,2], index: 4, kind: input, shape index: {}]   ;;  %s4403_s5 = inlined_call_operand.vmem [shape: f32[8,2], index: 5, kind: input, shape index: {}]   ;;  %s4404_s6 = inlined_call_operand.vmem [shape: f32[8,1], index: 6, kind: input, shape index: {}]   ;;  %s4405_s7 = inlined_call_operand.hbm [shape: bf16[1024,512], index: 7, kind: input, shape index: {}]   ;;  %s4406_s8 = inlined_call_operand.vmem [shape: f32[16,8], index: 8, kind: input, shape index: {}]   ;;  %s4407_s9 = inlined_call_operand.vmem [shape: f32[16,1], index: 9, kind: input, shape index: {}]   ;;  %s4408_s10 = inlined_call_operand.hbm [shape: f32[2,16,512], index: 10, kind: output, shape index: {}]  }
   0x1   :  { %16 = vsyncpa [#allocation6], 0 }
   0x2   :  { %17 = vsyncpa [#allocation4], 0 }
   0x3   :  { %19 = vsyncpa [#allocation4 + $0x1], 0  ;;  %s4092_s13 = smov 0   ;;  %s4094_s14 = smov 0  }
   0x4   :  { %s4096_s15 = smov 0   ;;  %s4098_s16 = smov 0  }
   0x5 LB: > { %s4113_s17 = sadd.s32 4294967295, %s4025_s16   ;;  %s3100_s18 = sadd.s32 4294967294, %s4025_s16   ;;  %s4025_s16 = sphi %s4098_s16, %s4426_s16   ;;  %s4021_s15 = sphi %s4096_s15, %s4425_s15   ;;  %s4017_s14 = sphi %s4094_s14, %s4424_s14   ;;  %s4013_s13 = sphi %s4092_s13, %s4423_s13  }
   0x6   : > { %s4117_s19 = sadd.s32 1, %s4025_s16   ;;  %s247_s20 = sadd.s32 1, %s4021_s15 }
   0x7   : > { %s244_s21 = ssub.s32 %s4025_s16, %s4117_s19  ;;  %p257_p0 = scmp.ne.s32.totalorder %s4021_s15, %s4017_s14 }
   0x8   : > { %p245_p1 = scmp.eq.s32.totalorder %s244_s21, 0  ;;  %p258_p2 = scmp.eq.s32.totalorder %s4113_s17, 1 }
   0x9   : > { %p263_p3 = scmp.ne.s32.totalorder %s4017_s14, %s4013_s13  ;;  %p264_p4 = scmp.eq.s32.totalorder %s3100_s18, 1 }
   0xa   : > { %s4128_s22 = scalar_select %p245_p1, %s4021_s15, %s247_s20  }
   0xb   : > { %p4130_p5 = por %p258_p2, %p257_p0  ;;  %p4134_p6 = por %p264_p4, %p263_p3 }
   0xc   : > { %p3101_p7 = scmp.ge.s32.totalorder %s4025_s16, 1  ;;  %p271_p8 = scmp.lt.s32.totalorder %s4025_s16, 3 }
   0xd   : > { %s4412_s23 = scalar_select %p4130_p5, 1, 0 }
   0xe   : > { %s4413_s24 = scalar_select %p4134_p6, 1, 0 }
   0xf   : > { %p4409_p9 = scmp.eq.s32.totalorder %s4113_s17, 0  ;;  %p4141_p10 = pnand %p3101_p7, %p271_p8 }
  0x10   : > { %s4027_s26 = smov [#allocation5]   ;;  %s4028_s28 = smov [#allocation2]  }
  0x11   : > { %s4414_s25 = scalar_select %p4141_p10, 1, 0 }
  0x12   : > { %s295_s27 = sshll.u32 %s4027_s26, 4  ;;  %p3403_p11 = pneg %p4141_p10  ;;  %s296_s27 = int_to_ptr.vmem [resolvable:$true] %s295_s27 }
  0x13   : > { %s284_s29 = sshll.u32 %s4028_s28, 4  ;;  %s4029_s11 = smov [#allocation7]   ;;  %s285_s29 = int_to_ptr.vmem [resolvable:$true] %s284_s29 }
  0x14   : > { %p4149_p12 = pnand %p4409_p9, %p3403_p11  ;;  %s317_s12 = sshll.u32 %s4029_s11, 4  ;;  %s4153_s12 = int_to_ptr.vmem [resolvable:$true] %s317_s12 }
  0x15   : > { %s3890_s18 = scalar_lea.vmem %s296_s27, 128  ;;  %p3898_p3 = scmp.lt.s32.totalorder %s296_s27, %s296_s27 }
  0x16   : > { %p3881_p13 = pneg %p4149_p12  ;;  %p3891_p0 = scmp.ne.s32.totalorder %s296_s27, %s3890_s18 }
  0x17   : > { %p3899_p4 = scmp.lt.s32.totalorder %s3890_s18, %s3890_s18 }
  0x18   : > { %p3893_p1 = pnand %p3891_p0, %p3881_p13 }
  0x19   : > { %p3900_p7 = por %p3899_p4, %p3898_p3 }
  0x1a   : > { %p3894_p2 = pneg %p3893_p1 }
  0x1c   : > { %p3901_p8 = pnand %p3900_p7, %p3894_p2 }
  0x1e   : > { %3904 = shalt.err (!%p3901_p8)
}
  0x1f   : > { %3409 = dma.hbm_to_vmem [thread:$0]  (!%p4149_p12), %s4400_s2, 128, %s296_s27, [#allocation6]  }
  0x20   : > { %s3916_s26 = scalar_lea.vmem %s285_s29, 128  ;;  %p3924_p0 = scmp.lt.s32.totalorder %s285_s29, %s285_s29 }
  0x21   : > { %p3917_p11 = scmp.ne.s32.totalorder %s285_s29, %s3916_s26  ;;  %p3925_p1 = scmp.lt.s32.totalorder %s3916_s26, %s3916_s26 }
  0x23   : > { %p3919_p9 = pnand %p3917_p11, %p3881_p13  ;;  %p3926_p5 = por %p3925_p1, %p3924_p0 }
  0x25   : > { %p3920_p6 = pneg %p3919_p9 }
  0x27   : > { %p3927_p10 = pnand %p3926_p5, %p3920_p6 }
  0x29   : > { %3930 = shalt.err (!%p3927_p10)
}
  0x2a   : > { %3406 = dma.hbm_to_vmem [thread:$0]  (!%p4149_p12), %s4399_s1, 128, %s285_s29, [#allocation3]  }
  0x2b   : > { %s3942_s27 = scalar_lea.vmem %s4153_s12, 32768  ;;  %p3950_p4 = scmp.lt.s32.totalorder %s4153_s12, %s4153_s12 }
  0x2c   : > { %p3943_p2 = scmp.ne.s32.totalorder %s4153_s12, %s3942_s27  ;;  %p3951_p5 = scmp.lt.s32.totalorder %s3942_s27, %s3942_s27 }
  0x2e   : > { %p3945_p9 = pnand %p3943_p2, %p3881_p13  ;;  %p3952_p6 = por %p3951_p5, %p3950_p4 }
  0x30   : > { %p3946_p3 = pneg %p3945_p9 }
  0x32   : > { %p3953_p10 = pnand %p3952_p6, %p3946_p3 }
  0x34   : > { %3956 = shalt.err (!%p3953_p10)
}
  0x35   : > { %s4030_s18 = smov 256   ;;  %s4031_s20 = smov 16  }
  0x36   : > { %3412 = dma.hbm_to_vmem [thread:$0]  (!%p4149_p12), %s4405_s7, 32768, %s4153_s12, [#allocation6], %s4030_s18, %s4030_s18, %s4031_s20  }
  0x37   : > { %p4416_p7 = scmp.ne.s32.totalorder %s4414_s25, 0 }
  0x38   : > { %p4417_p13 = scmp.eq.s32.totalorder (!%p4416_p7), %s4113_s17, 0 }
  0x39   : > { %347 = sbr.rel (%p4416_p7) target bundleno = 1949 (0x79d), region = 60 }
  0x3e   : > { %4000 = dma.done.wait (%p4417_p13), [#allocation3], 128   ;;  %p4418_p8 = pmov %p4417_p13 }
  0x40   : > { %4002 = vsyncadd (%p4418_p8), [#allocation3], 4294967168  ;;  %p4419_p11 = pmov %p4418_p8 }
  0x41   : > { %p4420_p0 = pmov %p4418_p8 }
  0x42   : > { %4004 = dma.done.wait (%p4419_p11), [#allocation6], 32896  }
  0x43   : > { %4006 = vsyncadd (%p4420_p0), [#allocation6], 4294934400  ;;  %p393_p1 = scmp.lt.s32.totalorder %s4113_s17, 1  ;;  %v4032_v0 = vmov 0.0   ;;  %v402_v3 = vld [vmem:[#allocation2] sm:$0xff]  ;;  %vm403_vm0 = vcmask 64512  }
  0x44   : > { %471 = vmatprep.mubr.f32.mxu0 %v4032_v0  ;;  %542 = vmatprep.mubr.f32.mxu1 %v4032_v0  ;;  %v585_v44 = vld [vmem:[#allocation5] sm:$0xff]  ;;  %vm773_vm1 = vcmask 15360   ;;  %s3388_s12 = sshll.u32 %s4113_s17, 10  ;;  %p4421_p2 = scmp.ne.s32.totalorder %s4412_s23, 0 }
  0x45   : > { %s394_s25 = scalar_select %p393_p1, %s4113_s17, 1 }
  0x46   : > { %s4354_s18 = scalar_lea.hbm %s4408_s10, %s3388_s12  ;;  %s4034_s21 = smov [#allocation8]  }
  0x47   : > { %s3387_s29 = sshll.u32 %s394_s25, 5  ;;  %s3961_s26 = sshll.u32 %s4034_s21, 4  ;;  %s3962_s26 = int_to_ptr.vmem [resolvable:$false] %s3961_s26 }
  0x48   : > { %s4203_s28 = scalar_lea.vmem %s4398_s0, %s3387_s29 }
  0x49   : > { %v399_v1 = vld [vmem:[%s4203_s28 + $0x8] sm:$0xff]  ;;  %v398_v2 = vld [vmem:[%s4203_s28] sm:$0xff]  ;;  %v401_v4 = vld [vmem:[%s4203_s28 + $0x18] sm:$0xff] }
  0x4a   : > { %437 = vmatprep.subr.mxu0 %v399_v1  ;;  %v400_v5 = vld [vmem:[%s4203_s28 + $0x10] sm:$0xff]  ;;  %508 = vmatprep.subr.mxu1 %v401_v4 }
  0x4b   : > { %438 = vmatpush1.msra.mxu0 %v398_v2  ;;  %509 = vmatpush1.msra.mxu1 %v400_v5 }
  0x4c   : > { %3113 = vmatmul.mubr.msk.f32.vlgmr.msra.gmra.mxu0 %vm403_vm0, %v402_v3  ;;  %3114 = vmatmul.mubr.msk.f32.vlgmr.msra.gmra.mxu1 %vm403_vm0, %v402_v3 }
  0x4d   : > { %653 = vmatprep.mubr.f32.mxu0 %v4032_v0  ;;  %724 = vmatprep.mubr.f32.mxu1 %v4032_v0 }
 0x10c   : > { %v473_v6 = vpop.f32.mrf.mxu0  ;;  %v544_v8 = vpop.f32.mrf.mxu1 }
 0x10d   : > { %v555_v9 = vmul.f32 %v473_v6, %v473_v6  ;;  %v557_v12 = vmul.f32 %v544_v8, %v544_v8 }
 0x10e   : > { %v475_v7 = vpop.f32.mrf.mxu0  ;;  %v546_v15 = vpop.f32.mrf.mxu1 }
 0x10f   : > { %v549_v10 = vadd.f32 %v475_v7, %v473_v6  ;;  %v556_v11 = vmul.f32 %v475_v7, %v475_v7  ;;  %v558_v18 = vmul.f32 %v546_v15, %v546_v15 }
 0x111   : > { %v550_v13 = vadd.f32 %v549_v10, %v544_v8  ;;  %v559_v14 = vadd.f32 %v556_v11, %v555_v9 }
 0x113   : > { %v551_v16 = vadd.f32 %v550_v13, %v546_v15  ;;  %v560_v17 = vadd.f32 %v559_v14, %v557_v12 }
 0x115   : > { %552 = vadd.xlane.f32.xlu0 %v551_v16  ;;  %v561_v19 = vadd.f32 %v560_v17, %v558_v18  ;;  %v771_v18 = vld [vmem:[%s4401_s3] sm:$0xff] }
 0x119   : > { %562 = vadd.xlane.f32.xlu0 %v561_v19 }
 0x19e   : > { %v553_v20 = vpop.xlane.xlu0 %552 }
 0x19f   : > { %v554_v21 = vmul.f32 0.001953125, %v553_v20 }
 0x1a1   : > { %v565_v23 = vmul.f32 %v554_v21, %v554_v21  ;;  %v568_v27 = vsub.f32 %v475_v7, %v554_v21  ;;  %v570_v28 = vsub.f32 %v546_v15, %v554_v21  ;;  %v567_v29 = vsub.f32 %v473_v6, %v554_v21 }
 0x1a2   : > { %v563_v22 = vpop.xlane.xlu0 %562  ;;  %v569_v30 = vsub.f32 %v544_v8, %v554_v21 }
 0x1a3   : > { %v564_v24 = vmul.f32 0.001953125, %v563_v22 }
 0x1a5   : > { %v566_v25 = vsub.f32 %v564_v24, %v565_v23 }
 0x1a7   : > { %v571_v26 = vadd.f32 1e-05, %v566_v25 }
 0x1a9   : > { %3851 = vrsqrt.f32 %v571_v26 }
 0x1b6   : > { %v3852_v31 = vpop.eup %3851 }
 0x1b7   : > { %v574_v32 = vmul.f32 %v3852_v31, %v568_v27  ;;  %v576_v33 = vmul.f32 %v3852_v31, %v570_v28  ;;  %v573_v34 = vmul.f32 %v3852_v31, %v567_v29  ;;  %v575_v35 = vmul.f32 %v3852_v31, %v569_v30 }
 0x1b9   : > { %v578_v36 = vmul.f32 0.01, %v574_v32  ;;  %v580_v37 = vmul.f32 0.01, %v576_v33  ;;  %v577_v38 = vmul.f32 0.01, %v573_v34 }
 0x1ba   : > { %v579_v39 = vmul.f32 0.01, %v575_v35 }
 0x1bb   : > { %v582_v40 = vmax.f32 %v574_v32, %v578_v36  ;;  %v584_v41 = vmax.f32 %v576_v33, %v580_v37  ;;  %v581_v42 = vmax.f32 %v573_v34, %v577_v38  ;;  %v796_v36 = vlaneseq  ;;  %v781_v37 = vld [vmem:[%s4402_s4] sm:$0x1] }
 0x1bc   : > { %v583_v43 = vmax.f32 %v575_v35, %v579_v39 }
 0x1bd   : > { %619 = vmatprep.subr.mxu0 %v582_v40  ;;  %690 = vmatprep.subr.mxu1 %v584_v41  ;;  %v797_v41 = vshrl.u32 %v796_v36, 7  ;;  %v3530_v36 = vld [vmem:[#allocation7 + $0x3a0] ss:$16 sps:$4 sm:$0xff]  }
 0x1be   : > { %620 = vmatpush1.msra.mxu0 %v581_v42  ;;  %691 = vmatpush1.msra.mxu1 %v583_v43 }
 0x1bf   : > { %3115 = vmatmul.mubr.msk.f32.vlgmr.msra.gmra.mxu0 %vm403_vm0, %v585_v44  ;;  %3116 = vmatmul.mubr.msk.f32.vlgmr.msra.gmra.mxu1 %vm403_vm0, %v585_v44 }
 0x27f   : > { %v655_v45 = vpop.f32.mrf.mxu0  ;;  %v726_v47 = vpop.f32.mrf.mxu1 }
 0x280   : > { %v737_v48 = vmul.f32 %v655_v45, %v655_v45  ;;  %v739_v51 = vmul.f32 %v726_v47, %v726_v47 }
 0x281   : > { %v657_v46 = vpop.f32.mrf.mxu0  ;;  %v728_v54 = vpop.f32.mrf.mxu1 }
 0x282   : > { %v731_v49 = vadd.f32 %v657_v46, %v655_v45  ;;  %v738_v50 = vmul.f32 %v657_v46, %v657_v46  ;;  %v740_v57 = vmul.f32 %v728_v54, %v728_v54 }
 0x284   : > { %v732_v52 = vadd.f32 %v731_v49, %v726_v47  ;;  %v741_v53 = vadd.f32 %v738_v50, %v737_v48 }
 0x286   : > { %v733_v55 = vadd.f32 %v732_v52, %v728_v54  ;;  %v742_v56 = vadd.f32 %v741_v53, %v739_v51  ;;  %v4033_v51 = vmov 0   ;;  %v3467_v52 = vld [vmem:[#allocation7 + $0xe0] ss:$16 sps:$4 sm:$0xff]   ;;  %v3469_v53 = vld [vmem:[#allocation7 + $0xe4] ss:$16 sps:$4 sm:$0xff]  }
 0x287   : > { %3465 = vset.pattern.permute.xlu1 %v4033_v51  ;;  %3466 = vset.pattern.permute.xlu0 %v4033_v51  ;;  %v3539_v51 = vld [vmem:[#allocation7 + $0x160] ss:$16 sps:$4 sm:$0xff]  }
 0x288   : > { %734 = vadd.xlane.f32.xlu1 %v733_v55  ;;  %v743_v58 = vadd.f32 %v742_v56, %v740_v57  ;;  %v3472_v55 = vld [vmem:[#allocation7 + $0x2e4] ss:$16 sps:$4 sm:$0xff]   ;;  %2419 = vmatprep.subr.bf16.mxu0 %v3469_v53 }
 0x289   : > { %v3475_v56 = vld [vmem:[#allocation7 + $0xc4] ss:$16 sps:$4 sm:$0xff]   ;;  %2460 = vmatprep.subr.bf16.mxu1 %v3472_v55  ;;  %2420 = vmatpush1.bf16.msra.mxu0 %v3467_v52  ;;  %v3542_v52 = vld [vmem:[#allocation7 + $0x360] ss:$16 sps:$4 sm:$0xff]  }
 0x28a   : > { %v3478_v57 = vld [vmem:[#allocation7 + $0x2c4] ss:$16 sps:$4 sm:$0xff]   ;;  %2421 = vmatprep.subr.bf16.mxu0 %v3475_v56  ;;  %v3545_v55 = vld [vmem:[#allocation7 + $0x140] ss:$16 sps:$4 sm:$0xff]  }
 0x28b   : > { %v3550_v56 = vld [vmem:[#allocation7 + $0x344] ss:$16 sps:$4 sm:$0xff]  }
 0x28c   : > { %744 = vadd.xlane.f32.xlu1 %v743_v58  ;;  %v3473_v58 = vld [vmem:[#allocation7 + $0xc0] ss:$16 sps:$4 sm:$0xff]  }
 0x28d   : > { %2422 = vmatpush1.bf16.msra.mxu0 %v3473_v58  ;;  %v3548_v58 = vld [vmem:[#allocation7 + $0x340] ss:$16 sps:$4 sm:$0xff]  }
 0x311   : > { %v735_v59 = vpop.xlane.xlu1 %734 }
 0x312   : > { %v736_v60 = vmul.f32 0.001953125, %v735_v59  ;;  %v3476_v59 = vld [vmem:[#allocation7 + $0x2c0] ss:$16 sps:$4 sm:$0xff]  }
 0x314   : > { %v747_v62 = vmul.f32 %v736_v60, %v736_v60  ;;  %v749_v3 = vsub.f32 %v655_v45, %v736_v60  ;;  %v750_v4 = vsub.f32 %v657_v46, %v736_v60  ;;  %v751_v5 = vsub.f32 %v726_v47, %v736_v60  ;;  %v795_v47 = vld [vmem:[%s4403_s5] sm:$0xff] }
 0x315   : > { %v745_v61 = vpop.xlane.xlu1 %744  ;;  %v752_v6 = vsub.f32 %v728_v54, %v736_v60  ;;  %v4239_v45 = vsub.s32 0, %v797_v41  ;;  %v3470_v54 = vld [vmem:[#allocation7 + $0x2e0] ss:$16 sps:$4 sm:$0xff]   ;;  %v3481_v60 = vld [vmem:[#allocation7 + $0xa4] ss:$16 sps:$4 sm:$0xff]  }
 0x316   : > { %v746_v63 = vmul.f32 0.001953125, %v745_v61  ;;  %2461 = vmatpush1.bf16.msra.mxu1 %v3470_v54  ;;  %v3484_v61 = vld [vmem:[#allocation7 + $0x2a4] ss:$16 sps:$4 sm:$0xff]   ;;  %2423 = vmatprep.subr.bf16.mxu0 %v3481_v60 }
 0x317   : > { %2462 = vmatprep.subr.bf16.mxu1 %v3478_v57  ;;  %v804_v41 = vld [vmem:[%s4404_s6] sm:$0xff]  ;;  %v2806_v57 = vld [vmem:[%s4407_s9 + $0x8] sm:$0xff] }
 0x318   : > { %v748_v1 = vsub.f32 %v746_v63, %v747_v62  ;;  %v3479_v62 = vld [vmem:[#allocation7 + $0xa0] ss:$16 sps:$4 sm:$0xff]   ;;  %v3547_v54 = vld [vmem:[#allocation7 + $0x144] ss:$16 sps:$4 sm:$0xff]  }
 0x319   : > { %v3482_v63 = vld [vmem:[#allocation7 + $0x2a0] ss:$16 sps:$4 sm:$0xff]   ;;  %2424 = vmatpush1.bf16.msra.mxu0 %v3479_v62  ;;  %v3556_v60 = vld [vmem:[#allocation7 + $0x324] ss:$16 sps:$4 sm:$0xff]  }
 0x31a   : > { %v753_v2 = vadd.f32 1e-05, %v748_v1  ;;  %2463 = vmatpush1.bf16.msra.mxu1 %v3476_v59  ;;  %v3487_v1 = vld [vmem:[#allocation7 + $0x84] ss:$16 sps:$4 sm:$0xff]   ;;  %v3554_v62 = vld [vmem:[#allocation7 + $0x320] ss:$16 sps:$4 sm:$0xff]  }
 0x31b   : > { %2464 = vmatprep.subr.bf16.mxu1 %v3484_v61  ;;  %2425 = vmatprep.subr.bf16.mxu0 %v3487_v1  ;;  %v3553_v59 = vld [vmem:[#allocation7 + $0x124] ss:$16 sps:$4 sm:$0xff]   ;;  %v3551_v61 = vld [vmem:[#allocation7 + $0x120] ss:$16 sps:$4 sm:$0xff]  }
 0x31c   : > { %3853 = vrsqrt.f32 %v753_v2  ;;  %v3490_v2 = vld [vmem:[#allocation7 + $0x284] ss:$16 sps:$4 sm:$0xff]  }
 0x31d   : > { %v3562_v1 = vld [vmem:[#allocation7 + $0x304] ss:$16 sps:$4 sm:$0xff]  }
 0x31e   : > { %2465 = vmatpush1.bf16.msra.mxu1 %v3482_v63  ;;  %v3559_v63 = vld [vmem:[#allocation7 + $0x104] ss:$16 sps:$4 sm:$0xff]  }
 0x31f   : > { %2466 = vmatprep.subr.bf16.mxu1 %v3490_v2  ;;  %v3557_v2 = vld [vmem:[#allocation7 + $0x100] ss:$16 sps:$4 sm:$0xff]  }
 0x329   : > { %v3854_v7 = vpop.eup %3853 }
 0x32a   : > { %v4215_v8 = vmul.f32 %v3854_v7, %v749_v3  ;;  %v4217_v9 = vmul.f32 %v3854_v7, %v750_v4  ;;  %v4219_v10 = vmul.f32 %v3854_v7, %v751_v5  ;;  %v4221_v11 = vmul.f32 %v3854_v7, %v752_v6  ;;  %v3485_v3 = vld [vmem:[#allocation7 + $0x80] ss:$16 sps:$4 sm:$0xff]   ;;  %v3493_v5 = vld [vmem:[#allocation7 + $0x64] ss:$16 sps:$4 sm:$0xff]  }
 0x32b   : > { %v3488_v4 = vld [vmem:[#allocation7 + $0x280] ss:$16 sps:$4 sm:$0xff]   ;;  %v3496_v6 = vld [vmem:[#allocation7 + $0x264] ss:$16 sps:$4 sm:$0xff]   ;;  %2426 = vmatpush1.bf16.msra.mxu0 %v3485_v3 }
 0x32c   : > { %v766_v12 = vmax.f32 %v4215_v8, %v4217_v9  ;;  %v767_v13 = vmax.f32 %v4219_v10, %v4221_v11  ;;  %v759_v14 = vadd.f32 %v4217_v9, %v4215_v8  ;;  %v3491_v7 = vld [vmem:[#allocation7 + $0x60] ss:$16 sps:$4 sm:$0xff]   ;;  %2467 = vmatpush1.bf16.msra.mxu1 %v3488_v4  ;;  %2427 = vmatprep.subr.bf16.mxu0 %v3493_v5  ;;  %v3565_v4 = vld [vmem:[#allocation7 + $0x4e4] ss:$16 sps:$4 sm:$0xff]  }
 0x32d   : > { %2468 = vmatprep.subr.bf16.mxu1 %v3496_v6  ;;  %v3560_v3 = vld [vmem:[#allocation7 + $0x300] ss:$16 sps:$4 sm:$0xff]   ;;  %v3568_v5 = vld [vmem:[#allocation7 + $0x6e4] ss:$16 sps:$4 sm:$0xff]  }
 0x32e   : > { %v768_v15 = vmax.f32 %v766_v12, %v767_v13  ;;  %v760_v16 = vadd.f32 %v759_v14, %v4219_v10  ;;  %v3494_v12 = vld [vmem:[#allocation7 + $0x260] ss:$16 sps:$4 sm:$0xff]   ;;  %v3499_v13 = vld [vmem:[#allocation7 + $0x44] ss:$16 sps:$4 sm:$0xff]  }
 0x32f   : > { %v3502_v14 = vld [vmem:[#allocation7 + $0x244] ss:$16 sps:$4 sm:$0xff]   ;;  %2428 = vmatpush1.bf16.msra.mxu0 %v3491_v7 }
 0x330   : > { %769 = vmax.xlane.f32.xlu1 %v768_v15  ;;  %v761_v17 = vadd.f32 %v760_v16, %v4221_v11  ;;  %v3497_v15 = vld [vmem:[#allocation7 + $0x40] ss:$16 sps:$4 sm:$0xff]   ;;  %2469 = vmatpush1.bf16.msra.mxu1 %v3494_v12 }
 0x331   : > { %2429 = vmatprep.subr.bf16.mxu0 %v3499_v13  ;;  %v3500_v16 = vld [vmem:[#allocation7 + $0x240] ss:$16 sps:$4 sm:$0xff]   ;;  %2470 = vmatprep.subr.bf16.mxu1 %v3502_v14 }
 0x332   : > { %762 = vadd.xlane.f32.xlu0 %v761_v17  ;;  %v3505_v17 = vld [vmem:[#allocation7 + $0x24] ss:$16 sps:$4 sm:$0xff]  }
 0x333   : > { %2430 = vmatpush1.bf16.msra.mxu0 %v3497_v15 }
 0x334   : > { %2471 = vmatpush1.bf16.msra.mxu1 %v3500_v16  ;;  %2431 = vmatprep.subr.bf16.mxu0 %v3505_v17 }
 0x3b9   : > { %v770_v19 = vpop.xlane.xlu1 %769 }
 0x3ba   : > { %v783_v20 = vmul.f32 %v771_v18, %v770_v19  ;;  %v3503_v19 = vld [vmem:[#allocation7 + $0x20] ss:$16 sps:$4 sm:$0xff]  }
 0x3bb   : > { %v763_v21 = vpop.xlane.xlu0 %762  ;;  %2432 = vmatpush1.bf16.msra.mxu0 %v3503_v19 }
 0x3bc   : > { %v784_v22 = vsel %vm773_vm1, %v783_v20, 0.0  ;;  %v765_v23 = vmul.f32 0.001953125, %v763_v21  ;;  %v3506_v20 = vld [vmem:[#allocation7 + $0x220] ss:$16 sps:$4 sm:$0xff]   ;;  %v3511_v21 = vld [vmem:[#allocation7 + $0x4] ss:$16 sps:$4 sm:$0xff]  }
 0x3bd   : > { %v785_v24 = vrot.slane %v784_v22, 4  ;;  %2433 = vmatprep.subr.bf16.mxu0 %v3511_v21 }
 0x3be   : > { %v772_v25 = vmul.f32 %v771_v18, %v765_v23  ;;  %v3508_v18 = vld [vmem:[#allocation7 + $0x224] ss:$16 sps:$4 sm:$0xff]   ;;  %v3509_v23 = vld [vmem:[#allocation7] ss:$16 sps:$4 sm:$0xff]  }
 0x3bf   : > { %v786_v26 = vadd.f32 %v785_v24, %v784_v22  ;;  %2472 = vmatprep.subr.bf16.mxu1 %v3508_v18  ;;  %v3514_v22 = vld [vmem:[#allocation7 + $0x204] ss:$16 sps:$4 sm:$0xff]   ;;  %v3512_v24 = vld [vmem:[#allocation7 + $0x200] ss:$16 sps:$4 sm:$0xff]   ;;  %2434 = vmatpush1.bf16.msra.mxu0 %v3509_v23 }
 0x3c0   : > { %v774_v27 = vsel %vm773_vm1, %v772_v25, 0.0  ;;  %2473 = vmatpush1.bf16.msra.mxu1 %v3506_v20  ;;  %v3517_v25 = vld [vmem:[#allocation7 + $0x1e4] ss:$16 sps:$4 sm:$0xff]  }
 0x3c1   : > { %v787_v28 = vrot.slane %v786_v26, 2  ;;  %v775_v29 = vrot.slane %v774_v27, 4  ;;  %2474 = vmatprep.subr.bf16.mxu1 %v3514_v22  ;;  %2435 = vmatprep.subr.bf16.mxu0 %v3517_v25 }
 0x3c3   : > { %v788_v30 = vadd.f32 %v787_v28, %v786_v26  ;;  %v776_v31 = vadd.f32 %v775_v29, %v774_v27  ;;  %v3520_v26 = vld [vmem:[#allocation7 + $0x3e4] ss:$16 sps:$4 sm:$0xff]   ;;  %v3515_v27 = vld [vmem:[#allocation7 + $0x1e0] ss:$16 sps:$4 sm:$0xff]  }
 0x3c4   : > { %2475 = vmatpush1.bf16.msra.mxu1 %v3512_v24  ;;  %v3518_v28 = vld [vmem:[#allocation7 + $0x3e0] ss:$16 sps:$4 sm:$0xff]   ;;  %v3523_v29 = vld [vmem:[#allocation7 + $0x1c4] ss:$16 sps:$4 sm:$0xff]   ;;  %2436 = vmatpush2.bf16.msra.mxu0 %v3515_v27 }
 0x3c5   : > { %v789_v32 = vrot.slane %v788_v30, 1  ;;  %v777_v33 = vrot.slane %v776_v31, 2  ;;  %2476 = vmatprep.subr.bf16.mxu1 %v3520_v26  ;;  %2437 = vmatprep.subr.bf16.mxu0 %v3523_v29 }
 0x3c7   : > { %v790_v34 = vadd.f32 %v789_v32, %v788_v30  ;;  %v778_v35 = vadd.f32 %v777_v33, %v776_v31  ;;  %v3526_v30 = vld [vmem:[#allocation7 + $0x3c4] ss:$16 sps:$4 sm:$0xff]   ;;  %v3521_v31 = vld [vmem:[#allocation7 + $0x1c0] ss:$16 sps:$4 sm:$0xff]  }
 0x3c8   : > { %2477 = vmatpush2.bf16.msra.mxu1 %v3518_v28  ;;  %v3524_v32 = vld [vmem:[#allocation7 + $0x3c0] ss:$16 sps:$4 sm:$0xff]   ;;  %v3529_v33 = vld [vmem:[#allocation7 + $0x1a4] ss:$16 sps:$4 sm:$0xff]   ;;  %2438 = vmatpush2.bf16.msra.mxu0 %v3521_v31 }
 0x3c9   : > { %v779_v38 = vrot.slane %v778_v35, 1  ;;  %v791_v40 = vadd.f32 %v790_v34, %v781_v37  ;;  %2478 = vmatprep.subr.bf16.mxu1 %v3526_v30  ;;  %v3532_v34 = vld [vmem:[#allocation7 + $0x3a4] ss:$16 sps:$4 sm:$0xff]   ;;  %2439 = vmatprep.subr.bf16.mxu0 %v3529_v33 }
 0x3cb   : > { %v780_v39 = vadd.f32 %v779_v38, %v778_v35  ;;  %v793_v44 = vmax.f32 %v791_v40, 0.0  ;;  %v3527_v35 = vld [vmem:[#allocation7 + $0x1a0] ss:$16 sps:$4 sm:$0xff]   ;;  %v3538_v38 = vld [vmem:[#allocation7 + $0x384] ss:$16 sps:$4 sm:$0xff]  }
 0x3cc   : > { %2479 = vmatpush2.bf16.msra.mxu1 %v3524_v32  ;;  %2440 = vmatpush2.bf16.msra.mxu0 %v3527_v35  ;;  %v3536_v40 = vld [vmem:[#allocation7 + $0x380] ss:$16 sps:$4 sm:$0xff]  }
 0x3cd   : > { %v782_v42 = vadd.f32 %v781_v37, %v780_v39  ;;  %v3535_v37 = vld [vmem:[#allocation7 + $0x184] ss:$16 sps:$4 sm:$0xff]   ;;  %2480 = vmatprep.subr.bf16.mxu1 %v3532_v34  ;;  %v3533_v39 = vld [vmem:[#allocation7 + $0x180] ss:$16 sps:$4 sm:$0xff]  }
 0x3ce   : > { %2441 = vmatprep.subr.bf16.mxu0 %v3535_v37 }
 0x3cf   : > { %v792_v43 = vmax.f32 %v782_v42, 0.0  ;;  %v805_v42 = vmul.f32 2.0, %v804_v41 }
 0x3d0   : > { %2481 = vmatpush2.bf16.msra.mxu1 %v3530_v36  ;;  %2442 = vmatpush2.bf16.msra.mxu0 %v3533_v39 }
 0x3d1   : > { %v794_v46 = vadd.f32 %v793_v44, %v792_v43  ;;  %2482 = vmatprep.subr.bf16.mxu1 %v3538_v38 }
 0x3d3   : > { %v799_v48 = vrot.slane %v794_v46, %v4239_v45 }
 0x3d4   : > { %2483 = vmatpush2.bf16.msra.mxu1 %v3536_v40 }
 0x3d5   : > { %v800_v49 = vmul.f32 %v799_v48, %v795_v47 }
 0x3d7   : > { %v801_v50 = vsel %vm773_vm1, %v800_v49, 0.0  ;;  %v3541_v49 = vld [vmem:[#allocation7 + $0x164] ss:$16 sps:$4 sm:$0xff]  }
 0x3d8   : > { %802 = vadd.xlane.f32.xlu0 %v801_v50  ;;  %v3544_v50 = vld [vmem:[#allocation7 + $0x364] ss:$16 sps:$4 sm:$0xff]   ;;  %2443 = vmatprep.subr.bf16.mxu0 %v3541_v49 }
 0x3d9   : > { %2484 = vmatprep.subr.bf16.mxu1 %v3544_v50  ;;  %2444 = vmatpush2.bf16.msra.mxu0 %v3539_v51 }
 0x3da   : > { %2485 = vmatpush2.bf16.msra.mxu1 %v3542_v52  ;;  %2445 = vmatprep.subr.bf16.mxu0 %v3547_v54  ;;  %v3563_v52 = vld [vmem:[#allocation7 + $0x4e0] ss:$16 sps:$4 sm:$0xff]  }
 0x3db   : > { %2486 = vmatprep.subr.bf16.mxu1 %v3550_v56  ;;  %v3571_v56 = vld [vmem:[#allocation7 + $0x4c4] ss:$16 sps:$4 sm:$0xff]  }
 0x3dd   : > { %2446 = vmatpush2.bf16.msra.mxu0 %v3545_v55 }
 0x3de   : > { %2487 = vmatpush2.bf16.msra.mxu1 %v3548_v58  ;;  %2447 = vmatprep.subr.bf16.mxu0 %v3553_v59 }
 0x3df   : > { %2488 = vmatprep.subr.bf16.mxu1 %v3556_v60  ;;  %v3569_v60 = vld [vmem:[#allocation7 + $0x4c0] ss:$16 sps:$4 sm:$0xff]  }
 0x3e1   : > { %2448 = vmatpush2.bf16.msra.mxu0 %v3551_v61  ;;  %v3572_v61 = vld [vmem:[#allocation7 + $0x6c0] ss:$16 sps:$4 sm:$0xff]  }
 0x3e2   : > { %2489 = vmatpush2.bf16.msra.mxu1 %v3554_v62  ;;  %2449 = vmatprep.subr.bf16.mxu0 %v3559_v63  ;;  %v3577_v62 = vld [vmem:[#allocation7 + $0x4a4] ss:$16 sps:$4 sm:$0xff]  }
 0x3e3   : > { %2490 = vmatprep.subr.bf16.mxu1 %v3562_v1  ;;  %v3580_v63 = vld [vmem:[#allocation7 + $0x6a4] ss:$16 sps:$4 sm:$0xff]   ;;  %v3575_v1 = vld [vmem:[#allocation7 + $0x4a0] ss:$16 sps:$4 sm:$0xff]  }
 0x3e5   : > { %2450 = vmatpush2.bf16.msra.mxu0 %v3557_v2  ;;  %v3578_v2 = vld [vmem:[#allocation7 + $0x6a0] ss:$16 sps:$4 sm:$0xff]  }
 0x3e6   : > { %2491 = vmatpush2.bf16.msra.mxu1 %v3560_v3  ;;  %2501 = vmatprep.subr.bf16.mxu0 %v3565_v4  ;;  %v3583_v3 = vld [vmem:[#allocation7 + $0x484] ss:$16 sps:$4 sm:$0xff]  }
 0x3e7   : > { %2542 = vmatprep.subr.bf16.mxu1 %v3568_v5  ;;  %v3586_v4 = vld [vmem:[#allocation7 + $0x684] ss:$16 sps:$4 sm:$0xff]   ;;  %v3581_v5 = vld [vmem:[#allocation7 + $0x480] ss:$16 sps:$4 sm:$0xff]  }
 0x461   : > { %v803_v43 = vpop.xlane.xlu0 %802 }
 0x462   : > { %v806_v44 = vadd.f32 %v805_v42, %v803_v43 }
 0x464   : > { %v3117_v46 = vmul.f32 -1.442695, %v806_v44 }
 0x466   : > { %3855 = vpow2.f32 %v3117_v46 }
 0x473   : > { %v3856_v47 = vpop.eup %3855 }
 0x474   : > { %v810_v48 = vadd.f32 1.0, %v3856_v47 }
 0x476   : > { %3857 = vrcp.f32 %v810_v48 }
 0x483   : > { %v3858_v53 = vpop.eup %3857 }
 0x484   : > { %815 = vperm.xlu1 %3465, %v3858_v53   ;;  %v3566_v53 = vld [vmem:[#allocation7 + $0x6e0] ss:$16 sps:$4 sm:$0xff]  }
 0x488   : > { %2814 = vperm.xlu1 %3465, %v2806_v57   ;;  %v3574_v57 = vld [vmem:[#allocation7 + $0x6c4] ss:$16 sps:$4 sm:$0xff]  }
 0x4ff   : > { %v816_v6 = vpop.permute.xlu1 %815 }
 0x500   : > { %v4253_v7 = vmul.f32 %v816_v6, %v4215_v8  ;;  %v4256_v12 = vmul.f32 %v816_v6, %v4217_v9  ;;  %v4259_v13 = vmul.f32 %v816_v6, %v4219_v10  ;;  %v4262_v14 = vmul.f32 %v816_v6, %v4221_v11  ;;  %v3584_v6 = vld [vmem:[#allocation7 + $0x680] ss:$16 sps:$4 sm:$0xff]  }
 0x502   : > { %v822_v15 = vrot.slane %v4253_v7, 4  ;;  %v834_v16 = vrot.slane %v4259_v13, 4  ;;  %v828_v17 = vrot.slane %v4256_v12, 4  ;;  %v840_v18 = vrot.slane %v4262_v14, 4 }
 0x504   : > { %v829_v8 = vadd.f32 %v828_v17, %v4256_v12  ;;  %v841_v19 = vadd.f32 %v840_v18, %v4262_v14  ;;  %v823_v9 = vadd.f32 %v822_v15, %v4253_v7  ;;  %v835_v10 = vadd.f32 %v834_v16, %v4259_v13 }
 0x505   : > { %v858_v11 = vmax.f32 %v4256_v12, %v828_v17  ;;  %v870_v20 = vmax.f32 %v4262_v14, %v840_v18  ;;  %v3589_v17 = vld [vmem:[#allocation7 + $0x464] ss:$16 sps:$4 sm:$0xff]  }
 0x506   : > { %v830_v21 = vrot.slane %v829_v8, 2  ;;  %v842_v22 = vrot.slane %v841_v19, 2  ;;  %v824_v23 = vrot.slane %v823_v9, 2  ;;  %v836_v24 = vrot.slane %v835_v10, 2  ;;  %v3592_v18 = vld [vmem:[#allocation7 + $0x664] ss:$16 sps:$4 sm:$0xff]  }
 0x507   : > { %v859_v25 = vrot.slane %v858_v11, 2  ;;  %v871_v26 = vrot.slane %v870_v20, 2 }
 0x508   : > { %v831_v27 = vadd.f32 %v830_v21, %v829_v8  ;;  %v843_v28 = vadd.f32 %v842_v22, %v841_v19  ;;  %v825_v29 = vadd.f32 %v824_v23, %v823_v9  ;;  %v837_v30 = vadd.f32 %v836_v24, %v835_v10  ;;  %v3587_v8 = vld [vmem:[#allocation7 + $0x460] ss:$16 sps:$4 sm:$0xff]   ;;  %v3595_v9 = vld [vmem:[#allocation7 + $0x444] ss:$16 sps:$4 sm:$0xff]  }
 0x509   : > { %v860_v31 = vmax.f32 %v858_v11, %v859_v25  ;;  %v872_v32 = vmax.f32 %v870_v20, %v871_v26  ;;  %v3590_v19 = vld [vmem:[#allocation7 + $0x660] ss:$16 sps:$4 sm:$0xff]   ;;  %v3598_v10 = vld [vmem:[#allocation7 + $0x644] ss:$16 sps:$4 sm:$0xff]  }
 0x50a   : > { %v832_v33 = vrot.slane %v831_v27, 1  ;;  %v844_v34 = vrot.slane %v843_v28, 1  ;;  %v826_v35 = vrot.slane %v825_v29, 1  ;;  %v838_v36 = vrot.slane %v837_v30, 1  ;;  %v3593_v11 = vld [vmem:[#allocation7 + $0x440] ss:$16 sps:$4 sm:$0xff]  }
 0x50b   : > { %v861_v37 = vrot.slane %v860_v31, 1  ;;  %v873_v38 = vrot.slane %v872_v32, 1  ;;  %v3596_v20 = vld [vmem:[#allocation7 + $0x640] ss:$16 sps:$4 sm:$0xff]   ;;  %v3601_v21 = vld [vmem:[#allocation7 + $0x424] ss:$16 sps:$4 sm:$0xff]  }
 0x50c   : > { %v833_v39 = vadd.f32 %v832_v33, %v831_v27  ;;  %v845_v40 = vadd.f32 %v844_v34, %v843_v28  ;;  %v827_v41 = vadd.f32 %v826_v35, %v825_v29  ;;  %v839_v42 = vadd.f32 %v838_v36, %v837_v30  ;;  %v3604_v22 = vld [vmem:[#allocation7 + $0x624] ss:$16 sps:$4 sm:$0xff]   ;;  %v3599_v23 = vld [vmem:[#allocation7 + $0x420] ss:$16 sps:$4 sm:$0xff]  }
 0x50d   : > { %v862_v48 = vmax.f32 %v860_v31, %v861_v37  ;;  %v874_v49 = vmax.f32 %v872_v32, %v873_v38  ;;  %v3602_v24 = vld [vmem:[#allocation7 + $0x620] ss:$16 sps:$4 sm:$0xff]   ;;  %v3607_v25 = vld [vmem:[#allocation7 + $0x404] ss:$16 sps:$4 sm:$0xff]  }
 0x50e   : > { %v848_v43 = vmul.f32 0.125, %v833_v39  ;;  %v850_v44 = vmul.f32 0.125, %v845_v40  ;;  %v847_v46 = vmul.f32 0.125, %v827_v41  ;;  %v849_v47 = vmul.f32 0.125, %v839_v42  ;;  %v3610_v26 = vld [vmem:[#allocation7 + $0x604] ss:$16 sps:$4 sm:$0xff]  }
 0x50f   : > { %v4290_v58 = vpack.c.bf16 %v862_v48, %v862_v48  ;;  %v4292_v59 = vpack.c.bf16 %v874_v49, %v874_v49  ;;  %v3605_v27 = vld [vmem:[#allocation7 + $0x400] ss:$16 sps:$4 sm:$0xff]   ;;  %v3613_v29 = vld [vmem:[#allocation7 + $0x5e4] ss:$16 sps:$4 sm:$0xff]   ;;  %v852_v48 = vmax.f32 %v4253_v7, %v822_v15  ;;  %v864_v49 = vmax.f32 %v4259_v13, %v834_v16 }
 0x510   : > { %v4278_v50 = vpack.c.bf16 %v848_v43, %v848_v43  ;;  %v4280_v51 = vpack.c.bf16 %v850_v44, %v850_v44  ;;  %v4282_v54 = vpack.c.bf16 %v847_v46, %v847_v46  ;;  %v4284_v55 = vpack.c.bf16 %v849_v47, %v849_v47  ;;  %v3608_v28 = vld [vmem:[#allocation7 + $0x600] ss:$16 sps:$4 sm:$0xff]   ;;  %v3616_v30 = vld [vmem:[#allocation7 + $0x7e4] ss:$16 sps:$4 sm:$0xff]  }
 0x511   : > { %v3611_v31 = vld [vmem:[#allocation7 + $0x5e0] ss:$16 sps:$4 sm:$0xff]   ;;  %v3619_v33 = vld [vmem:[#allocation7 + $0x5c4] ss:$16 sps:$4 sm:$0xff]  }
 0x512   : > { %2451 = vmatprep.mubr.bf16.mxu0 %v4278_v50  ;;  %2492 = vmatprep.mubr.bf16.mxu1 %v4280_v51  ;;  %v3614_v32 = vld [vmem:[#allocation7 + $0x7e0] ss:$16 sps:$4 sm:$0xff]   ;;  %v3622_v34 = vld [vmem:[#allocation7 + $0x7c4] ss:$16 sps:$4 sm:$0xff]  }
 0x513   : > { %2452 = vmatmul.mubr.bf16.vlgmr.msra.gmra.mxu0 %v4282_v54  ;;  %2493 = vmatmul.mubr.bf16.vlgmr.msra.gmra.mxu1 %v4284_v55  ;;  %v3617_v35 = vld [vmem:[#allocation7 + $0x5c0] ss:$16 sps:$4 sm:$0xff]   ;;  %v3625_v37 = vld [vmem:[#allocation7 + $0x5a4] ss:$16 sps:$4 sm:$0xff]  }
 0x514   : > { %2502 = vmatpush1.bf16.msra.mxu0 %v3563_v52  ;;  %2543 = vmatpush1.bf16.msra.mxu1 %v3566_v53  ;;  %v3620_v36 = vld [vmem:[#allocation7 + $0x7c0] ss:$16 sps:$4 sm:$0xff]   ;;  %v3628_v38 = vld [vmem:[#allocation7 + $0x7a4] ss:$16 sps:$4 sm:$0xff]  }
 0x515   : > { %2533 = vmatprep.mubr.bf16.mxu0 %v4290_v58  ;;  %2574 = vmatprep.mubr.bf16.mxu1 %v4292_v59  ;;  %v3623_v39 = vld [vmem:[#allocation7 + $0x5a0] ss:$16 sps:$4 sm:$0xff]   ;;  %v3631_v41 = vld [vmem:[#allocation7 + $0x584] ss:$16 sps:$4 sm:$0xff]  }
 0x516   : > { %2503 = vmatprep.subr.bf16.mxu0 %v3571_v56  ;;  %2544 = vmatprep.subr.bf16.mxu1 %v3574_v57  ;;  %v3626_v40 = vld [vmem:[#allocation7 + $0x7a0] ss:$16 sps:$4 sm:$0xff]   ;;  %v3634_v42 = vld [vmem:[#allocation7 + $0x784] ss:$16 sps:$4 sm:$0xff]  }
 0x517   : > { %v3629_v43 = vld [vmem:[#allocation7 + $0x580] ss:$16 sps:$4 sm:$0xff]   ;;  %v3637_v46 = vld [vmem:[#allocation7 + $0x564] ss:$16 sps:$4 sm:$0xff]  }
 0x518   : > { %2504 = vmatpush1.bf16.msra.mxu0 %v3569_v60  ;;  %2545 = vmatpush1.bf16.msra.mxu1 %v3572_v61  ;;  %v3632_v44 = vld [vmem:[#allocation7 + $0x780] ss:$16 sps:$4 sm:$0xff]   ;;  %v3640_v47 = vld [vmem:[#allocation7 + $0x764] ss:$16 sps:$4 sm:$0xff]   ;;  %v853_v60 = vrot.slane %v852_v48, 2  ;;  %v865_v61 = vrot.slane %v864_v49, 2 }
 0x519   : > { %2505 = vmatprep.subr.bf16.mxu0 %v3577_v62  ;;  %2546 = vmatprep.subr.bf16.mxu1 %v3580_v63  ;;  %v3635_v52 = vld [vmem:[#allocation7 + $0x560] ss:$16 sps:$4 sm:$0xff]   ;;  %v3643_v56 = vld [vmem:[#allocation7 + $0x544] ss:$16 sps:$4 sm:$0xff]  }
 0x51a   : > { %v3638_v53 = vld [vmem:[#allocation7 + $0x760] ss:$16 sps:$4 sm:$0xff]   ;;  %v3646_v57 = vld [vmem:[#allocation7 + $0x744] ss:$16 sps:$4 sm:$0xff]   ;;  %v866_v16 = vmax.f32 %v864_v49, %v865_v61  ;;  %v3706_v49 = vld [vmem:[#allocation7 + $0x20c] ss:$16 sps:$4 sm:$0xff]  }
 0x51b   : > { %v3641_v62 = vld [vmem:[#allocation7 + $0x540] ss:$16 sps:$4 sm:$0xff]   ;;  %v3649_v15 = vld [vmem:[#allocation7 + $0x524] ss:$16 sps:$4 sm:$0xff]   ;;  %v3710_v61 = vld [vmem:[#allocation7 + $0x3e8] ss:$16 sps:$4 sm:$0xff]  }
 0x51c   : > { %2506 = vmatpush1.bf16.msra.mxu0 %v3575_v1  ;;  %2547 = vmatpush1.bf16.msra.mxu1 %v3578_v2  ;;  %v3644_v63 = vld [vmem:[#allocation7 + $0x740] ss:$16 sps:$4 sm:$0xff]   ;;  %v3652_v1 = vld [vmem:[#allocation7 + $0x724] ss:$16 sps:$4 sm:$0xff]   ;;  %v854_v2 = vmax.f32 %v852_v48, %v853_v60  ;;  %v3703_v48 = vld [vmem:[#allocation7 + $0xc] ss:$16 sps:$4 sm:$0xff]  }
 0x51d   : > { %2507 = vmatprep.subr.bf16.mxu0 %v3583_v3  ;;  %2548 = vmatprep.subr.bf16.mxu1 %v3586_v4  ;;  %v3647_v3 = vld [vmem:[#allocation7 + $0x520] ss:$16 sps:$4 sm:$0xff]   ;;  %v3707_v60 = vld [vmem:[#allocation7 + $0x1e8] ss:$16 sps:$4 sm:$0xff]  }
 0x51e   : > { %v3650_v4 = vld [vmem:[#allocation7 + $0x720] ss:$16 sps:$4 sm:$0xff]  }
 0x520   : > { %2508 = vmatpush1.bf16.msra.mxu0 %v3581_v5  ;;  %2549 = vmatpush1.bf16.msra.mxu1 %v3584_v6  ;;  %v3655_v5 = vld [vmem:[#allocation7 + $0x504] ss:$16 sps:$4 sm:$0xff]  }
 0x521   : > { %2509 = vmatprep.subr.bf16.mxu0 %v3589_v17  ;;  %2550 = vmatprep.subr.bf16.mxu1 %v3592_v18  ;;  %v3658_v6 = vld [vmem:[#allocation7 + $0x704] ss:$16 sps:$4 sm:$0xff]   ;;  %v855_v17 = vrot.slane %v854_v2, 1  ;;  %v867_v18 = vrot.slane %v866_v16, 1 }
 0x524   : > { %2510 = vmatpush1.bf16.msra.mxu0 %v3587_v8  ;;  %2551 = vmatpush1.bf16.msra.mxu1 %v3590_v19  ;;  %v3653_v8 = vld [vmem:[#allocation7 + $0x500] ss:$16 sps:$4 sm:$0xff]  }
 0x525   : > { %2511 = vmatprep.subr.bf16.mxu0 %v3595_v9  ;;  %2552 = vmatprep.subr.bf16.mxu1 %v3598_v10  ;;  %v3656_v19 = vld [vmem:[#allocation7 + $0x700] ss:$16 sps:$4 sm:$0xff]   ;;  %v856_v9 = vmax.f32 %v854_v2, %v855_v17  ;;  %v868_v10 = vmax.f32 %v866_v16, %v867_v18  ;;  %v3721_v2 = vld [vmem:[#allocation7 + $0x1ac] ss:$16 sps:$4 sm:$0xff]   ;;  %v3725_v17 = vld [vmem:[#allocation7 + $0x188] ss:$16 sps:$4 sm:$0xff]  }
 0x526   : > { %v3724_v16 = vld [vmem:[#allocation7 + $0x3ac] ss:$16 sps:$4 sm:$0xff]   ;;  %v3728_v18 = vld [vmem:[#allocation7 + $0x388] ss:$16 sps:$4 sm:$0xff]  }
 0x528   : > { %2512 = vmatpush1.bf16.msra.mxu0 %v3593_v11  ;;  %2553 = vmatpush1.bf16.msra.mxu1 %v3596_v20  ;;  %v3661_v11 = vld [vmem:[#allocation7 + $0xec] ss:$16 sps:$4 sm:$0xff]  }
 0x529   : > { %2513 = vmatprep.subr.bf16.mxu0 %v3601_v21  ;;  %2554 = vmatprep.subr.bf16.mxu1 %v3604_v22  ;;  %v3664_v20 = vld [vmem:[#allocation7 + $0x2ec] ss:$16 sps:$4 sm:$0xff]   ;;  %v3659_v21 = vld [vmem:[#allocation7 + $0xe8] ss:$16 sps:$4 sm:$0xff]   ;;  %v4302_v22 = vpack.c.bf16 %v856_v9, %v856_v9 }
 0x52a   : > { %v3731_v9 = vld [vmem:[#allocation7 + $0x168] ss:$16 sps:$4 sm:$0xff]  }
 0x52c   : > { %2514 = vmatpush1.bf16.msra.mxu0 %v3599_v23  ;;  %2555 = vmatpush1.bf16.msra.mxu1 %v3602_v24  ;;  %v4304_v23 = vpack.c.bf16 %v868_v10, %v868_v10  ;;  %v3662_v24 = vld [vmem:[#allocation7 + $0x2e8] ss:$16 sps:$4 sm:$0xff]  }
 0x52d   : > { %2515 = vmatprep.subr.bf16.mxu0 %v3607_v25  ;;  %2556 = vmatprep.subr.bf16.mxu1 %v3610_v26  ;;  %v3667_v25 = vld [vmem:[#allocation7 + $0xcc] ss:$16 sps:$4 sm:$0xff]   ;;  %v3734_v10 = vld [vmem:[#allocation7 + $0x368] ss:$16 sps:$4 sm:$0xff]  }
 0x52e   : > { %v3670_v26 = vld [vmem:[#allocation7 + $0x2cc] ss:$16 sps:$4 sm:$0xff]  }
 0x530   : > { %2516 = vmatpush1.bf16.msra.mxu0 %v3605_v27  ;;  %2557 = vmatpush1.bf16.msra.mxu1 %v3608_v28  ;;  %v3665_v27 = vld [vmem:[#allocation7 + $0xc8] ss:$16 sps:$4 sm:$0xff]  }
 0x531   : > { %2517 = vmatprep.subr.bf16.mxu0 %v3613_v29  ;;  %2558 = vmatprep.subr.bf16.mxu1 %v3616_v30  ;;  %v3668_v28 = vld [vmem:[#allocation7 + $0x2c8] ss:$16 sps:$4 sm:$0xff]   ;;  %v3673_v29 = vld [vmem:[#allocation7 + $0xac] ss:$16 sps:$4 sm:$0xff]  }
 0x532   : > { %v3676_v30 = vld [vmem:[#allocation7 + $0x2ac] ss:$16 sps:$4 sm:$0xff]  }
 0x534   : > { %2518 = vmatpush2.bf16.msra.mxu0 %v3611_v31  ;;  %2559 = vmatpush2.bf16.msra.mxu1 %v3614_v32  ;;  %v3671_v31 = vld [vmem:[#allocation7 + $0xa8] ss:$16 sps:$4 sm:$0xff]  }
 0x535   : > { %2519 = vmatprep.subr.bf16.mxu0 %v3619_v33  ;;  %2560 = vmatprep.subr.bf16.mxu1 %v3622_v34  ;;  %v3674_v32 = vld [vmem:[#allocation7 + $0x2a8] ss:$16 sps:$4 sm:$0xff]   ;;  %v3679_v33 = vld [vmem:[#allocation7 + $0x8c] ss:$16 sps:$4 sm:$0xff]  }
 0x536   : > { %v3682_v34 = vld [vmem:[#allocation7 + $0x28c] ss:$16 sps:$4 sm:$0xff]  }
 0x538   : > { %2520 = vmatpush2.bf16.msra.mxu0 %v3617_v35  ;;  %2561 = vmatpush2.bf16.msra.mxu1 %v3620_v36  ;;  %v3677_v35 = vld [vmem:[#allocation7 + $0x88] ss:$16 sps:$4 sm:$0xff]   ;;  %v3685_v36 = vld [vmem:[#allocation7 + $0x6c] ss:$16 sps:$4 sm:$0xff]  }
 0x539   : > { %2521 = vmatprep.subr.bf16.mxu0 %v3625_v37  ;;  %2562 = vmatprep.subr.bf16.mxu1 %v3628_v38  ;;  %v3683_v37 = vld [vmem:[#allocation7 + $0x68] ss:$16 sps:$4 sm:$0xff]  }
 0x53a   : > { %v3686_v38 = vld [vmem:[#allocation7 + $0x268] ss:$16 sps:$4 sm:$0xff]  }
 0x53c   : > { %2522 = vmatpush2.bf16.msra.mxu0 %v3623_v39  ;;  %2563 = vmatpush2.bf16.msra.mxu1 %v3626_v40  ;;  %v3691_v39 = vld [vmem:[#allocation7 + $0x4c] ss:$16 sps:$4 sm:$0xff]  }
 0x53d   : > { %2523 = vmatprep.subr.bf16.mxu0 %v3631_v41  ;;  %2564 = vmatprep.subr.bf16.mxu1 %v3634_v42  ;;  %v3694_v40 = vld [vmem:[#allocation7 + $0x24c] ss:$16 sps:$4 sm:$0xff]   ;;  %v3689_v41 = vld [vmem:[#allocation7 + $0x48] ss:$16 sps:$4 sm:$0xff]  }
 0x53e   : > { %v3692_v42 = vld [vmem:[#allocation7 + $0x248] ss:$16 sps:$4 sm:$0xff]  }
 0x540   : > { %2524 = vmatpush2.bf16.msra.mxu0 %v3629_v43  ;;  %2565 = vmatpush2.bf16.msra.mxu1 %v3632_v44  ;;  %v3697_v43 = vld [vmem:[#allocation7 + $0x2c] ss:$16 sps:$4 sm:$0xff]  }
 0x541   : > { %2525 = vmatprep.subr.bf16.mxu0 %v3637_v46  ;;  %2566 = vmatprep.subr.bf16.mxu1 %v3640_v47  ;;  %v3700_v44 = vld [vmem:[#allocation7 + $0x22c] ss:$16 sps:$4 sm:$0xff]   ;;  %v3695_v46 = vld [vmem:[#allocation7 + $0x28] ss:$16 sps:$4 sm:$0xff]  }
 0x542   : > { %v3698_v47 = vld [vmem:[#allocation7 + $0x228] ss:$16 sps:$4 sm:$0xff]  }
 0x544   : > { %2526 = vmatpush2.bf16.msra.mxu0 %v3635_v52  ;;  %2567 = vmatpush2.bf16.msra.mxu1 %v3638_v53  ;;  %v3701_v52 = vld [vmem:[#allocation7 + $0x8] ss:$16 sps:$4 sm:$0xff]  }
 0x545   : > { %2527 = vmatprep.subr.bf16.mxu0 %v3643_v56  ;;  %2568 = vmatprep.subr.bf16.mxu1 %v3646_v57  ;;  %v3704_v53 = vld [vmem:[#allocation7 + $0x208] ss:$16 sps:$4 sm:$0xff]   ;;  %v3709_v56 = vld [vmem:[#allocation7 + $0x1ec] ss:$16 sps:$4 sm:$0xff]  }
 0x546   : > { %v3712_v57 = vld [vmem:[#allocation7 + $0x3ec] ss:$16 sps:$4 sm:$0xff]  }
 0x548   : > { %2528 = vmatpush2.bf16.msra.mxu0 %v3641_v62  ;;  %2569 = vmatpush2.bf16.msra.mxu1 %v3644_v63  ;;  %v3715_v62 = vld [vmem:[#allocation7 + $0x1cc] ss:$16 sps:$4 sm:$0xff]  }
 0x549   : > { %2529 = vmatprep.subr.bf16.mxu0 %v3649_v15  ;;  %2570 = vmatprep.subr.bf16.mxu1 %v3652_v1  ;;  %v3718_v63 = vld [vmem:[#allocation7 + $0x3cc] ss:$16 sps:$4 sm:$0xff]   ;;  %v3713_v15 = vld [vmem:[#allocation7 + $0x1c8] ss:$16 sps:$4 sm:$0xff]  }
 0x54a   : > { %v3716_v1 = vld [vmem:[#allocation7 + $0x3c8] ss:$16 sps:$4 sm:$0xff]  }
 0x54c   : > { %2530 = vmatpush2.bf16.msra.mxu0 %v3647_v3  ;;  %2571 = vmatpush2.bf16.msra.mxu1 %v3650_v4  ;;  %v3719_v3 = vld [vmem:[#allocation7 + $0x1a8] ss:$16 sps:$4 sm:$0xff]  }
 0x54d   : > { %2531 = vmatprep.subr.bf16.mxu0 %v3655_v5  ;;  %2572 = vmatprep.subr.bf16.mxu1 %v3658_v6  ;;  %v3722_v4 = vld [vmem:[#allocation7 + $0x3a8] ss:$16 sps:$4 sm:$0xff]   ;;  %v3727_v5 = vld [vmem:[#allocation7 + $0x18c] ss:$16 sps:$4 sm:$0xff]  }
 0x54e   : > { %v3730_v6 = vld [vmem:[#allocation7 + $0x38c] ss:$16 sps:$4 sm:$0xff]  }
 0x550   : > { %2532 = vmatpush2.bf16.msra.mxu0 %v3653_v8  ;;  %2573 = vmatpush2.bf16.msra.mxu1 %v3656_v19  ;;  %v3733_v8 = vld [vmem:[#allocation7 + $0x16c] ss:$16 sps:$4 sm:$0xff]  }
 0x551   : > { %2583 = vmatprep.subr.bf16.mxu0 %v3661_v11  ;;  %2624 = vmatprep.subr.bf16.mxu1 %v3664_v20  ;;  %v3736_v19 = vld [vmem:[#allocation7 + $0x36c] ss:$16 sps:$4 sm:$0xff]  }
 0x552   : > { %v3739_v11 = vld [vmem:[#allocation7 + $0x14c] ss:$16 sps:$4 sm:$0xff]  }
 0x553   : > { %2534 = vmatmul.mubr.bf16.vlgmr.msra.gmra.mxu0 %v4302_v22  ;;  %2575 = vmatmul.mubr.bf16.vlgmr.msra.gmra.mxu1 %v4304_v23  ;;  %v3742_v20 = vld [vmem:[#allocation7 + $0x34c] ss:$16 sps:$4 sm:$0xff]  }
 0x554   : > { %2584 = vmatpush1.bf16.msra.mxu0 %v3659_v21  ;;  %2615 = vmatprep.mubr.bf16.mxu0 %v4278_v50  ;;  %v3680_v50 = vld [vmem:[#allocation7 + $0x288] ss:$16 sps:$4 sm:$0xff]  }
 0x555   : > { %2625 = vmatpush1.bf16.msra.mxu1 %v3662_v24  ;;  %2656 = vmatprep.mubr.bf16.mxu1 %v4280_v51  ;;  %v3688_v51 = vld [vmem:[#allocation7 + $0x26c] ss:$16 sps:$4 sm:$0xff]   ;;  %v3737_v21 = vld [vmem:[#allocation7 + $0x148] ss:$16 sps:$4 sm:$0xff]  }
 0x556   : > { %2585 = vmatprep.subr.bf16.mxu0 %v3667_v25  ;;  %2626 = vmatprep.subr.bf16.mxu1 %v3670_v26  ;;  %v3740_v24 = vld [vmem:[#allocation7 + $0x348] ss:$16 sps:$4 sm:$0xff]   ;;  %v3745_v25 = vld [vmem:[#allocation7 + $0x12c] ss:$16 sps:$4 sm:$0xff]  }
 0x557   : > { %v3748_v26 = vld [vmem:[#allocation7 + $0x32c] ss:$16 sps:$4 sm:$0xff]  }
 0x558   : > { %2586 = vmatpush1.bf16.msra.mxu0 %v3665_v27  ;;  %v3743_v27 = vld [vmem:[#allocation7 + $0x128] ss:$16 sps:$4 sm:$0xff]  }
 0x559   : > { %2627 = vmatpush1.bf16.msra.mxu1 %v3668_v28  ;;  %2587 = vmatprep.subr.bf16.mxu0 %v3673_v29  ;;  %v3746_v28 = vld [vmem:[#allocation7 + $0x328] ss:$16 sps:$4 sm:$0xff]   ;;  %v3751_v29 = vld [vmem:[#allocation7 + $0x10c] ss:$16 sps:$4 sm:$0xff]  }
 0x55a   : > { %2628 = vmatprep.subr.bf16.mxu1 %v3676_v30  ;;  %v3754_v30 = vld [vmem:[#allocation7 + $0x30c] ss:$16 sps:$4 sm:$0xff]  }
 0x55c   : > { %2588 = vmatpush1.bf16.msra.mxu0 %v3671_v31  ;;  %v3749_v31 = vld [vmem:[#allocation7 + $0x108] ss:$16 sps:$4 sm:$0xff]  }
 0x55d   : > { %2629 = vmatpush1.bf16.msra.mxu1 %v3674_v32  ;;  %2589 = vmatprep.subr.bf16.mxu0 %v3679_v33  ;;  %v3752_v32 = vld [vmem:[#allocation7 + $0x308] ss:$16 sps:$4 sm:$0xff]   ;;  %v3757_v33 = vld [vmem:[#allocation7 + $0x4ec] ss:$16 sps:$4 sm:$0xff]  }
 0x55e   : > { %2630 = vmatprep.subr.bf16.mxu1 %v3682_v34  ;;  %v3760_v34 = vld [vmem:[#allocation7 + $0x6ec] ss:$16 sps:$4 sm:$0xff]  }
 0x560   : > { %2590 = vmatpush1.bf16.msra.mxu0 %v3677_v35  ;;  %v3755_v35 = vld [vmem:[#allocation7 + $0x4e8] ss:$16 sps:$4 sm:$0xff]  }
 0x561   : > { %2631 = vmatpush1.bf16.msra.mxu1 %v3680_v50  ;;  %2591 = vmatprep.subr.bf16.mxu0 %v3685_v36  ;;  %v3758_v50 = vld [vmem:[#allocation7 + $0x6e8] ss:$16 sps:$4 sm:$0xff]   ;;  %v3763_v36 = vld [vmem:[#allocation7 + $0x4cc] ss:$16 sps:$4 sm:$0xff]  }
 0x562   : > { %2632 = vmatprep.subr.bf16.mxu1 %v3688_v51  ;;  %v3766_v51 = vld [vmem:[#allocation7 + $0x6cc] ss:$16 sps:$4 sm:$0xff]  }
 0x564   : > { %2592 = vmatpush1.bf16.msra.mxu0 %v3683_v37  ;;  %v3761_v37 = vld [vmem:[#allocation7 + $0x4c8] ss:$16 sps:$4 sm:$0xff]  }
 0x565   : > { %2633 = vmatpush1.bf16.msra.mxu1 %v3686_v38  ;;  %2593 = vmatprep.subr.bf16.mxu0 %v3691_v39  ;;  %v3764_v38 = vld [vmem:[#allocation7 + $0x6c8] ss:$16 sps:$4 sm:$0xff]   ;;  %v3769_v39 = vld [vmem:[#allocation7 + $0x4ac] ss:$16 sps:$4 sm:$0xff]  }
 0x566   : > { %2634 = vmatprep.subr.bf16.mxu1 %v3694_v40  ;;  %v3772_v40 = vld [vmem:[#allocation7 + $0x6ac] ss:$16 sps:$4 sm:$0xff]  }
 0x568   : > { %2594 = vmatpush1.bf16.msra.mxu0 %v3689_v41  ;;  %v3767_v41 = vld [vmem:[#allocation7 + $0x4a8] ss:$16 sps:$4 sm:$0xff]  }
 0x569   : > { %2635 = vmatpush1.bf16.msra.mxu1 %v3692_v42  ;;  %2595 = vmatprep.subr.bf16.mxu0 %v3697_v43  ;;  %v3775_v42 = vld [vmem:[#allocation7 + $0x48c] ss:$16 sps:$4 sm:$0xff]   ;;  %v3773_v43 = vld [vmem:[#allocation7 + $0x488] ss:$16 sps:$4 sm:$0xff]  }
 0x56a   : > { %2636 = vmatprep.subr.bf16.mxu1 %v3700_v44  ;;  %v3781_v44 = vld [vmem:[#allocation7 + $0x46c] ss:$16 sps:$4 sm:$0xff]  }
 0x56c   : > { %2596 = vmatpush1.bf16.msra.mxu0 %v3695_v46  ;;  %v3784_v46 = vld [vmem:[#allocation7 + $0x66c] ss:$16 sps:$4 sm:$0xff]  }
 0x56d   : > { %2637 = vmatpush1.bf16.msra.mxu1 %v3698_v47  ;;  %2597 = vmatprep.subr.bf16.mxu0 %v3703_v48  ;;  %v3782_v47 = vld [vmem:[#allocation7 + $0x668] ss:$16 sps:$4 sm:$0xff]   ;;  %v3787_v48 = vld [vmem:[#allocation7 + $0x44c] ss:$16 sps:$4 sm:$0xff]  }
 0x56e   : > { %2638 = vmatprep.subr.bf16.mxu1 %v3706_v49  ;;  %v3790_v49 = vld [vmem:[#allocation7 + $0x64c] ss:$16 sps:$4 sm:$0xff]  }
 0x570   : > { %2598 = vmatpush1.bf16.msra.mxu0 %v3701_v52  ;;  %v3785_v52 = vld [vmem:[#allocation7 + $0x448] ss:$16 sps:$4 sm:$0xff]  }
 0x571   : > { %2639 = vmatpush1.bf16.msra.mxu1 %v3704_v53  ;;  %2599 = vmatprep.subr.bf16.mxu0 %v3709_v56  ;;  %v3788_v53 = vld [vmem:[#allocation7 + $0x648] ss:$16 sps:$4 sm:$0xff]   ;;  %v3793_v56 = vld [vmem:[#allocation7 + $0x42c] ss:$16 sps:$4 sm:$0xff]  }
 0x572   : > { %2640 = vmatprep.subr.bf16.mxu1 %v3712_v57  ;;  %v3796_v57 = vld [vmem:[#allocation7 + $0x62c] ss:$16 sps:$4 sm:$0xff]  }
 0x574   : > { %2600 = vmatpush2.bf16.msra.mxu0 %v3707_v60  ;;  %v3791_v60 = vld [vmem:[#allocation7 + $0x428] ss:$16 sps:$4 sm:$0xff]  }
 0x575   : > { %2641 = vmatpush2.bf16.msra.mxu1 %v3710_v61  ;;  %2601 = vmatprep.subr.bf16.mxu0 %v3715_v62  ;;  %v3794_v61 = vld [vmem:[#allocation7 + $0x628] ss:$16 sps:$4 sm:$0xff]   ;;  %v3799_v62 = vld [vmem:[#allocation7 + $0x40c] ss:$16 sps:$4 sm:$0xff]  }
 0x576   : > { %2642 = vmatprep.subr.bf16.mxu1 %v3718_v63  ;;  %v3802_v63 = vld [vmem:[#allocation7 + $0x60c] ss:$16 sps:$4 sm:$0xff]  }
 0x578   : > { %2602 = vmatpush2.bf16.msra.mxu0 %v3713_v15  ;;  %v3797_v15 = vld [vmem:[#allocation7 + $0x408] ss:$16 sps:$4 sm:$0xff]  }
 0x579   : > { %2643 = vmatpush2.bf16.msra.mxu1 %v3716_v1  ;;  %2603 = vmatprep.subr.bf16.mxu0 %v3721_v2  ;;  %v3800_v1 = vld [vmem:[#allocation7 + $0x608] ss:$16 sps:$4 sm:$0xff]   ;;  %v3805_v2 = vld [vmem:[#allocation7 + $0x5ec] ss:$16 sps:$4 sm:$0xff]  }
 0x57a   : > { %2644 = vmatprep.subr.bf16.mxu1 %v3724_v16  ;;  %v3808_v16 = vld [vmem:[#allocation7 + $0x7ec] ss:$16 sps:$4 sm:$0xff]  }
 0x57c   : > { %2604 = vmatpush2.bf16.msra.mxu0 %v3719_v3  ;;  %v3803_v3 = vld [vmem:[#allocation7 + $0x5e8] ss:$16 sps:$4 sm:$0xff]  }
 0x57d   : > { %2645 = vmatpush2.bf16.msra.mxu1 %v3722_v4  ;;  %2605 = vmatprep.subr.bf16.mxu0 %v3727_v5  ;;  %v3806_v4 = vld [vmem:[#allocation7 + $0x7e8] ss:$16 sps:$4 sm:$0xff]   ;;  %v3811_v5 = vld [vmem:[#allocation7 + $0x5cc] ss:$16 sps:$4 sm:$0xff]  }
 0x57e   : > { %2646 = vmatprep.subr.bf16.mxu1 %v3730_v6  ;;  %v3814_v6 = vld [vmem:[#allocation7 + $0x7cc] ss:$16 sps:$4 sm:$0xff]  }
 0x580   : > { %2606 = vmatpush2.bf16.msra.mxu0 %v3725_v17  ;;  %v3809_v17 = vld [vmem:[#allocation7 + $0x5c8] ss:$16 sps:$4 sm:$0xff]  }
 0x581   : > { %2647 = vmatpush2.bf16.msra.mxu1 %v3728_v18  ;;  %2607 = vmatprep.subr.bf16.mxu0 %v3733_v8  ;;  %v3812_v18 = vld [vmem:[#allocation7 + $0x7c8] ss:$16 sps:$4 sm:$0xff]   ;;  %v3817_v8 = vld [vmem:[#allocation7 + $0x5ac] ss:$16 sps:$4 sm:$0xff]  }
 0x582   : > { %2648 = vmatprep.subr.bf16.mxu1 %v3736_v19  ;;  %v3820_v19 = vld [vmem:[#allocation7 + $0x7ac] ss:$16 sps:$4 sm:$0xff]  }
 0x584   : > { %2608 = vmatpush2.bf16.msra.mxu0 %v3731_v9  ;;  %v3815_v9 = vld [vmem:[#allocation7 + $0x5a8] ss:$16 sps:$4 sm:$0xff]  }
 0x585   : > { %2649 = vmatpush2.bf16.msra.mxu1 %v3734_v10  ;;  %2609 = vmatprep.subr.bf16.mxu0 %v3739_v11  ;;  %v3818_v10 = vld [vmem:[#allocation7 + $0x7a8] ss:$16 sps:$4 sm:$0xff]   ;;  %v3823_v11 = vld [vmem:[#allocation7 + $0x58c] ss:$16 sps:$4 sm:$0xff]  }
 0x586   : > { %2650 = vmatprep.subr.bf16.mxu1 %v3742_v20  ;;  %v3826_v20 = vld [vmem:[#allocation7 + $0x78c] ss:$16 sps:$4 sm:$0xff]  }
 0x588   : > { %2610 = vmatpush2.bf16.msra.mxu0 %v3737_v21  ;;  %v3821_v21 = vld [vmem:[#allocation7 + $0x588] ss:$16 sps:$4 sm:$0xff]  }
 0x589   : > { %2651 = vmatpush2.bf16.msra.mxu1 %v3740_v24  ;;  %2611 = vmatprep.subr.bf16.mxu0 %v3745_v25  ;;  %v3824_v24 = vld [vmem:[#allocation7 + $0x788] ss:$16 sps:$4 sm:$0xff]   ;;  %v3829_v25 = vld [vmem:[#allocation7 + $0x56c] ss:$16 sps:$4 sm:$0xff]  }
 0x58a   : > { %2652 = vmatprep.subr.bf16.mxu1 %v3748_v26  ;;  %v3832_v26 = vld [vmem:[#allocation7 + $0x76c] ss:$16 sps:$4 sm:$0xff]  }
 0x58c   : > { %2612 = vmatpush2.bf16.msra.mxu0 %v3743_v27  ;;  %v3827_v27 = vld [vmem:[#allocation7 + $0x568] ss:$16 sps:$4 sm:$0xff]  }
 0x58d   : > { %2653 = vmatpush2.bf16.msra.mxu1 %v3746_v28  ;;  %2613 = vmatprep.subr.bf16.mxu0 %v3751_v29  ;;  %v3830_v28 = vld [vmem:[#allocation7 + $0x768] ss:$16 sps:$4 sm:$0xff]   ;;  %v3835_v29 = vld [vmem:[#allocation7 + $0x54c] ss:$16 sps:$4 sm:$0xff]  }
 0x58e   : > { %2654 = vmatprep.subr.bf16.mxu1 %v3754_v30  ;;  %v3838_v30 = vld [vmem:[#allocation7 + $0x74c] ss:$16 sps:$4 sm:$0xff]  }
 0x590   : > { %2614 = vmatpush2.bf16.msra.mxu0 %v3749_v31  ;;  %v3833_v31 = vld [vmem:[#allocation7 + $0x548] ss:$16 sps:$4 sm:$0xff]  }
 0x591   : > { %2655 = vmatpush2.bf16.msra.mxu1 %v3752_v32  ;;  %2665 = vmatprep.subr.bf16.mxu0 %v3757_v33  ;;  %v3836_v32 = vld [vmem:[#allocation7 + $0x748] ss:$16 sps:$4 sm:$0xff]   ;;  %v3841_v33 = vld [vmem:[#allocation7 + $0x52c] ss:$16 sps:$4 sm:$0xff]  }
 0x592   : > { %2706 = vmatprep.subr.bf16.mxu1 %v3760_v34  ;;  %v3844_v34 = vld [vmem:[#allocation7 + $0x72c] ss:$16 sps:$4 sm:$0xff]  }
 0x593   : > { %2616 = vmatmul.mubr.bf16.vlgmr.msra.gmra.mxu0 %v4282_v54  ;;  %v3770_v54 = vld [vmem:[#allocation7 + $0x6a8] ss:$16 sps:$4 sm:$0xff]  }
 0x594   : > { %2657 = vmatmul.mubr.bf16.vlgmr.msra.gmra.mxu1 %v4284_v55  ;;  %2666 = vmatpush1.bf16.msra.mxu0 %v3755_v35  ;;  %v3778_v55 = vld [vmem:[#allocation7 + $0x68c] ss:$16 sps:$4 sm:$0xff]   ;;  %v3839_v35 = vld [vmem:[#allocation7 + $0x528] ss:$16 sps:$4 sm:$0xff]  }
 0x595   : > { %2697 = vmatprep.mubr.bf16.mxu0 %v4290_v58  ;;  %2707 = vmatpush1.bf16.msra.mxu1 %v3758_v50  ;;  %v3776_v58 = vld [vmem:[#allocation7 + $0x688] ss:$16 sps:$4 sm:$0xff]  }
 0x596   : > { %2738 = vmatprep.mubr.bf16.mxu1 %v4292_v59  ;;  %2667 = vmatprep.subr.bf16.mxu0 %v3763_v36  ;;  %v3779_v59 = vld [vmem:[#allocation7 + $0x468] ss:$16 sps:$4 sm:$0xff]   ;;  %v3847_v36 = vld [vmem:[#allocation7 + $0x50c] ss:$16 sps:$4 sm:$0xff]  }
 0x597   : > { %2708 = vmatprep.subr.bf16.mxu1 %v3766_v51  ;;  %v3842_v50 = vld [vmem:[#allocation7 + $0x728] ss:$16 sps:$4 sm:$0xff]   ;;  %v3850_v51 = vld [vmem:[#allocation7 + $0x70c] ss:$16 sps:$4 sm:$0xff]  }
 0x598   : > { %2668 = vmatpush1.bf16.msra.mxu0 %v3761_v37  ;;  %v3845_v37 = vld [vmem:[#allocation7 + $0x508] ss:$16 sps:$4 sm:$0xff]  }
 0x599   : > { %2709 = vmatpush1.bf16.msra.mxu1 %v3764_v38  ;;  %2669 = vmatprep.subr.bf16.mxu0 %v3769_v39  ;;  %v3848_v38 = vld [vmem:[#allocation7 + $0x708] ss:$16 sps:$4 sm:$0xff]  }
 0x59a   : > { %2710 = vmatprep.subr.bf16.mxu1 %v3772_v40 }
 0x59c   : > { %2670 = vmatpush1.bf16.msra.mxu0 %v3767_v41 }
 0x59d   : > { %2711 = vmatpush1.bf16.msra.mxu1 %v3770_v54  ;;  %2671 = vmatprep.subr.bf16.mxu0 %v3775_v42 }
 0x59e   : > { %2712 = vmatprep.subr.bf16.mxu1 %v3778_v55 }
 0x5a0   : > { %2672 = vmatpush1.bf16.msra.mxu0 %v3773_v43 }
 0x5a1   : > { %2713 = vmatpush1.bf16.msra.mxu1 %v3776_v58  ;;  %2673 = vmatprep.subr.bf16.mxu0 %v3781_v44 }
 0x5a2   : > { %2714 = vmatprep.subr.bf16.mxu1 %v3784_v46 }
 0x5a4   : > { %2674 = vmatpush1.bf16.msra.mxu0 %v3779_v59 }
 0x5a5   : > { %2715 = vmatpush1.bf16.msra.mxu1 %v3782_v47  ;;  %2675 = vmatprep.subr.bf16.mxu0 %v3787_v48 }
 0x5a6   : > { %2716 = vmatprep.subr.bf16.mxu1 %v3790_v49 }
 0x5a8   : > { %2676 = vmatpush1.bf16.msra.mxu0 %v3785_v52 }
 0x5a9   : > { %2717 = vmatpush1.bf16.msra.mxu1 %v3788_v53  ;;  %2677 = vmatprep.subr.bf16.mxu0 %v3793_v56 }
 0x5aa   : > { %2718 = vmatprep.subr.bf16.mxu1 %v3796_v57 }
 0x5ac   : > { %2678 = vmatpush1.bf16.msra.mxu0 %v3791_v60 }
 0x5ad   : > { %2719 = vmatpush1.bf16.msra.mxu1 %v3794_v61  ;;  %2679 = vmatprep.subr.bf16.mxu0 %v3799_v62 }
 0x5ae   : > { %2720 = vmatprep.subr.bf16.mxu1 %v3802_v63 }
 0x5b0   : > { %2680 = vmatpush1.bf16.msra.mxu0 %v3797_v15 }
 0x5b1   : > { %2721 = vmatpush1.bf16.msra.mxu1 %v3800_v1  ;;  %2681 = vmatprep.subr.bf16.mxu0 %v3805_v2 }
 0x5b2   : > { %2722 = vmatprep.subr.bf16.mxu1 %v3808_v16 }
 0x5b4   : > { %2682 = vmatpush2.bf16.msra.mxu0 %v3803_v3 }
 0x5b5   : > { %2723 = vmatpush2.bf16.msra.mxu1 %v3806_v4  ;;  %2683 = vmatprep.subr.bf16.mxu0 %v3811_v5  ;;  %v3875_v4 = vld [vmem:[%s4203_s28] sm:$0xff] }
 0x5b6   : > { %2724 = vmatprep.subr.bf16.mxu1 %v3814_v6  ;;  %v2791_v5 = vmul.f32 2.0, %v3875_v4  ;;  %v2815_v4 = vpop.permute.xlu1 %2814 }
 0x5b8   : > { %2684 = vmatpush2.bf16.msra.mxu0 %v3809_v17 }
 0x5b9   : > { %2725 = vmatpush2.bf16.msra.mxu1 %v3812_v18  ;;  %2685 = vmatprep.subr.bf16.mxu0 %v3817_v8  ;;  %v3876_v18 = vld [vmem:[%s4203_s28 + $0x8] sm:$0xff] }
 0x5ba   : > { %2726 = vmatprep.subr.bf16.mxu1 %v3820_v19  ;;  %v2792_v8 = vmul.f32 2.0, %v3876_v18 }
 0x5bc   : > { %2686 = vmatpush2.bf16.msra.mxu0 %v3815_v9 }
 0x5bd   : > { %2727 = vmatpush2.bf16.msra.mxu1 %v3818_v10  ;;  %2687 = vmatprep.subr.bf16.mxu0 %v3823_v11 }
 0x5be   : > { %2728 = vmatprep.subr.bf16.mxu1 %v3826_v20 }
 0x5c0   : > { %2688 = vmatpush2.bf16.msra.mxu0 %v3821_v21 }
 0x5c1   : > { %2729 = vmatpush2.bf16.msra.mxu1 %v3824_v24  ;;  %2689 = vmatprep.subr.bf16.mxu0 %v3829_v25  ;;  %v2803_v25 = vld [vmem:[%s4406_s8] sm:$0xff] }
 0x5c2   : > { %2730 = vmatprep.subr.bf16.mxu1 %v3832_v26 }
 0x5c4   : > { %2690 = vmatpush2.bf16.msra.mxu0 %v3827_v27 }
 0x5c5   : > { %2731 = vmatpush2.bf16.msra.mxu1 %v3830_v28  ;;  %2691 = vmatprep.subr.bf16.mxu0 %v3835_v29 }
 0x5c6   : > { %2732 = vmatprep.subr.bf16.mxu1 %v3838_v30 }
 0x5c8   : > { %2692 = vmatpush2.bf16.msra.mxu0 %v3833_v31 }
 0x5c9   : > { %2733 = vmatpush2.bf16.msra.mxu1 %v3836_v32  ;;  %2693 = vmatprep.subr.bf16.mxu0 %v3841_v33 }
 0x5ca   : > { %2734 = vmatprep.subr.bf16.mxu1 %v3844_v34  ;;  %v2805_v34 = vld [vmem:[%s4407_s9] sm:$0xff] }
 0x5cb   : > { %2809 = vperm.xlu0 %3466, %v2805_v34  }
 0x5cc   : > { %2694 = vmatpush2.bf16.msra.mxu0 %v3839_v35 }
 0x5cd   : > { %2735 = vmatpush2.bf16.msra.mxu1 %v3842_v50  ;;  %2695 = vmatprep.subr.bf16.mxu0 %v3847_v36 }
 0x5ce   : > { %2736 = vmatprep.subr.bf16.mxu1 %v3850_v51 }
 0x5d0   : > { %2696 = vmatpush2.bf16.msra.mxu0 %v3845_v37 }
 0x5d1   : > { %2737 = vmatpush2.bf16.msra.mxu1 %v3848_v38 }
 0x5d3   : > { %2698 = vmatmul.mubr.bf16.vlgmr.msra.gmra.mxu0 %v4302_v22  ;;  %v2453_v39 = vpop.f32.mrf.mxu0  ;;  %v2494_v40 = vpop.f32.mrf.mxu1 }
 0x5d4   : > { %2739 = vmatmul.mubr.bf16.vlgmr.msra.gmra.mxu1 %v4304_v23  ;;  %v2495_v41 = vadd.f32 %v2494_v40, %v2453_v39  ;;  %2887 = vmatprep.mubr.f32.mxu0 %v4032_v0 }
 0x5d5   : > { %v2455_v54 = vpop.f32.mrf.mxu0  ;;  %v2496_v42 = vpop.f32.mrf.mxu1  ;;  %2964 = vmatprep.mubr.f32.mxu1 %v4032_v0 }
 0x5d6   : > { %v2497_v47 = vadd.f32 %v2496_v42, %v2455_v54 }
 0x5d7   : > { %v2457_v55 = vpop.f32.mrf.mxu0  ;;  %v2498_v43 = vpop.f32.mrf.mxu1 }
 0x5d9   : > { %v2458_v58 = vpop.f32.mrf.mxu0  ;;  %v2499_v44 = vpop.f32.mrf.mxu1 }
 0x613   : > { %v2535_v46 = vpop.f32.mrf.mxu0  ;;  %v2576_v59 = vpop.f32.mrf.mxu1 }
 0x614   : > { %v2536_v48 = vadd.f32 %v2535_v46, %v2495_v41 }
 0x615   : > { %v2537_v22 = vpop.f32.mrf.mxu0  ;;  %v2578_v49 = vpop.f32.mrf.mxu1 }
 0x616   : > { %v2577_v52 = vadd.f32 %v2576_v59, %v2536_v48  ;;  %v2538_v53 = vadd.f32 %v2537_v22, %v2497_v47 }
 0x617   : > { %v2539_v23 = vpop.f32.mrf.mxu0  ;;  %v2580_v56 = vpop.f32.mrf.mxu1 }
 0x618   : > { %v3374_v57 = vmul.f32 -1.442695, %v2577_v52  ;;  %v2579_v60 = vadd.f32 %v2578_v49, %v2538_v53  ;;  %v3877_v49 = vld [vmem:[%s4203_s28 + $0x10] sm:$0xff]  ;;  %v3878_v56 = vld [vmem:[%s4203_s28 + $0x18] sm:$0xff]  ;;  %s390_s28 = sand.u32 1, %s4017_s14  }
 0x619   : > { %v2540_v61 = vpop.f32.mrf.mxu0  ;;  %v2581_v62 = vpop.f32.mrf.mxu1  ;;  %v2793_v52 = vmul.f32 2.0, %v3877_v49  ;;  %s3110_s25 = sshll.u32 %s390_s28, 6  ;;  %s4358_s20 = scalar_lea.sflag [#allocation4], %s390_s28 }
 0x61a   : > { %3859 = vpow2.f32 %v3374_v57  ;;  %v3375_v63 = vmul.f32 -1.442695, %v2579_v60  ;;  %v2794_v57 = vmul.f32 2.0, %v3878_v56  ;;  %s392_s29 = scalar_lea.vmem [#allocation8], %s3110_s25  ;;  %s3963_s25 = scalar_lea.vmem %s3962_s26, 2048 }
 0x61b   : > { %s3007_s30 = sshll.u32 %s392_s29, 4  ;;  %s4349_s30 = int_to_ptr.vmem [resolvable:$true] %s3007_s30 }
 0x61c   : > { %3861 = vpow2.f32 %v3375_v63  ;;  %s3957_s17 = scalar_lea.vmem %s4349_s30, 1024  ;;  %p3964_p4 = scmp.lt.s32.totalorder %s4349_s30, %s3962_s26 }
 0x61d   : > { %p3958_p12 = scmp.ne.s32.totalorder %s4349_s30, %s3957_s17  ;;  %p3965_p5 = scmp.lt.s32.totalorder %s3963_s25, %s3957_s17 }
 0x61f   : > { %p3959_p9 = pnand %p3958_p12, %p4421_p2  ;;  %p3966_p6 = por %p3965_p5, %p3964_p4 }
 0x621   : > { %p3960_p3 = pneg %p3959_p9 }
 0x623   : > { %p3967_p10 = pnand %p3966_p6, %p3960_p3 }
 0x627   : > { %v3860_v15 = vpop.eup %3859 }
 0x628   : > { %v2759_v1 = vadd.f32 1.0, %v3860_v15 }
 0x629   : > { %v3862_v2 = vpop.eup %3861 }
 0x62a   : > { %3863 = vrcp.f32 %v2759_v1  ;;  %v2760_v16 = vadd.f32 1.0, %v3862_v2 }
 0x62c   : > { %3865 = vrcp.f32 %v2760_v16 }
 0x637   : > { %v3864_v3 = vpop.eup %3863 }
 0x638   : > { %v2774_v6 = vrot.slane %v3864_v3, %v4239_v45 }
 0x639   : > { %v3866_v17 = vpop.eup %3865 }
 0x63a   : > { %v2778_v19 = vrot.slane %v3866_v17, %v4239_v45  ;;  %v2787_v9 = vmul.f32 %v2774_v6, %v4253_v7  ;;  %v2804_v7 = vld [vmem:[%s4406_s8 + $0x8] sm:$0xff] }
 0x63c   : > { %v2788_v10 = vmul.f32 %v2778_v19, %v4256_v12  ;;  %v2795_v11 = vadd.f32 %v2791_v5, %v2787_v9 }
 0x63e   : > { %v2796_v20 = vadd.f32 %v2792_v8, %v2788_v10  ;;  %v2799_v24 = vmax.f32 %v2795_v11, 0.0 }
 0x640   : > { %v2800_v21 = vmax.f32 %v2796_v20, 0.0 }
 0x642   : > { %2853 = vmatprep.subr.mxu0 %v2800_v21 }
 0x643   : > { %2854 = vmatpush1.msra.mxu0 %v2799_v24 }
 0x644   : > { %3378 = vmatmul.mubr.msk.f32.vlgmr.msra.gmra.mxu0 %vm403_vm0, %v2803_v25 }
 0x645   : > { %2893 = vmatprep.mubr.f32.mxu0 %v4032_v0 }
 0x646   : > { %v2810_v3 = vpop.permute.xlu0 %2809 }
 0x648   : > { %3379 = vmatmul.mubr.msk.f32.gmra.mxu0 %vm403_vm0, %v2804_v7 }
 0x653   : > { %v2617_v12 = vpop.f32.mrf.mxu0 }
 0x654   : > { %v2658_v26 = vpop.f32.mrf.mxu1 }
 0x655   : > { %v2659_v27 = vadd.f32 %v2658_v26, %v2617_v12  ;;  %v2619_v28 = vpop.f32.mrf.mxu0 }
 0x656   : > { %v2660_v29 = vpop.f32.mrf.mxu1 }
 0x657   : > { %v2621_v30 = vpop.f32.mrf.mxu0  ;;  %v2661_v50 = vadd.f32 %v2660_v29, %v2619_v28 }
 0x658   : > { %v2662_v31 = vpop.f32.mrf.mxu1 }
 0x659   : > { %v2622_v32 = vpop.f32.mrf.mxu0 }
 0x65a   : > { %v2663_v33 = vpop.f32.mrf.mxu1 }
 0x693   : > { %v2699_v35 = vpop.f32.mrf.mxu0 }
 0x694   : > { %v2700_v36 = vadd.f32 %v2699_v35, %v2659_v27  ;;  %v2740_v51 = vpop.f32.mrf.mxu1 }
 0x695   : > { %v2701_v37 = vpop.f32.mrf.mxu0 }
 0x696   : > { %v2741_v38 = vadd.f32 %v2740_v51, %v2700_v36  ;;  %v2702_v39 = vadd.f32 %v2701_v37, %v2661_v50  ;;  %v2742_v40 = vpop.f32.mrf.mxu1 }
 0x697   : > { %v2703_v41 = vpop.f32.mrf.mxu0 }
 0x698   : > { %v3376_v54 = vmul.f32 -1.442695, %v2741_v38  ;;  %v2743_v42 = vadd.f32 %v2742_v40, %v2702_v39  ;;  %v2744_v55 = vpop.f32.mrf.mxu1 }
 0x699   : > { %v2704_v43 = vpop.f32.mrf.mxu0 }
 0x69a   : > { %3867 = vpow2.f32 %v3376_v54  ;;  %v3377_v58 = vmul.f32 -1.442695, %v2743_v42  ;;  %v2745_v44 = vpop.f32.mrf.mxu1 }
 0x69c   : > { %3869 = vpow2.f32 %v3377_v58 }
 0x6a7   : > { %v3868_v46 = vpop.eup %3867 }
 0x6a8   : > { %v2761_v59 = vadd.f32 1.0, %v3868_v46 }
 0x6a9   : > { %v3870_v47 = vpop.eup %3869 }
 0x6aa   : > { %3871 = vrcp.f32 %v2761_v59  ;;  %v2762_v48 = vadd.f32 1.0, %v3870_v47 }
 0x6ac   : > { %3873 = vrcp.f32 %v2762_v48 }
 0x6b7   : > { %v3872_v22 = vpop.eup %3871 }
 0x6b8   : > { %v2782_v53 = vrot.slane %v3872_v22, %v4239_v45 }
 0x6b9   : > { %v3874_v23 = vpop.eup %3873 }
 0x6ba   : > { %v2786_v60 = vrot.slane %v3874_v23, %v4239_v45  ;;  %v2789_v61 = vmul.f32 %v2782_v53, %v4259_v13 }
 0x6bc   : > { %v2790_v62 = vmul.f32 %v2786_v60, %v4262_v14  ;;  %v2797_v63 = vadd.f32 %v2793_v52, %v2789_v61 }
 0x6be   : > { %v2798_v15 = vadd.f32 %v2794_v57, %v2790_v62  ;;  %v2801_v2 = vmax.f32 %v2797_v63, 0.0 }
 0x6c0   : > { %v2802_v1 = vmax.f32 %v2798_v15, 0.0 }
 0x6c2   : > { %2930 = vmatprep.subr.mxu1 %v2802_v1 }
 0x6c3   : > { %2931 = vmatpush1.msra.mxu1 %v2801_v2 }
 0x6c4   : > { %3380 = vmatmul.mubr.msk.f32.vlgmr.msra.gmra.mxu1 %vm403_vm0, %v2803_v25 }
 0x6c5   : > { %2970 = vmatprep.mubr.f32.mxu1 %v4032_v0 }
 0x6c8   : > { %3381 = vmatmul.mubr.msk.f32.gmra.mxu1 %vm403_vm0, %v2804_v7 }
 0x704   : > { %v2889_v16 = vpop.f32.mrf.mxu0 }
 0x705   : > { %v2890_v13 = vadd.f32 %v2889_v16, %v2810_v3 }
 0x706   : > { %v2891_v45 = vpop.f32.mrf.mxu0 }
 0x707   : > { %v2892_v14 = vadd.f32 %v2891_v45, %v2810_v3  ;;  %v2977_v17 = vmax.f32 %v2890_v13, 0.0 }
 0x708   : > { %v2895_v5 = vpop.f32.mrf.mxu0 }
 0x709   : > { %v2896_v6 = vadd.f32 %v2895_v5, %v2815_v4  ;;  %v2978_v18 = vmax.f32 %v2892_v14, 0.0  ;;  %2985 = vst [vmem:[%s392_s29] sm:$0xff] %v2977_v17 }
 0x70a   : > { %v2897_v8 = vpop.f32.mrf.mxu0 }
 0x70b   : > { %v2981_v19 = vmax.f32 %v2896_v6, 0.0  ;;  %v2898_v9 = vadd.f32 %v2897_v8, %v2815_v4  ;;  %2986 = vst [vmem:[%s392_s29 + $0x8] sm:$0xff] %v2978_v18 }
 0x70d   : > { %2989 = vst [vmem:[%s392_s29 + $0x20] sm:$0xff] %v2981_v19  ;;  %v2982_v0 = vmax.f32 %v2898_v9, 0.0 }
 0x70f   : > { %2990 = vst [vmem:[%s392_s29 + $0x28] sm:$0xff] %v2982_v0 }
 0x784   : > { %v2966_v10 = vpop.f32.mrf.mxu1 }
 0x785   : > { %v2967_v11 = vadd.f32 %v2966_v10, %v2810_v3 }
 0x786   : > { %v2968_v20 = vpop.f32.mrf.mxu1 }
 0x787   : > { %v2969_v21 = vadd.f32 %v2968_v20, %v2810_v3  ;;  %v2979_v24 = vmax.f32 %v2967_v11, 0.0 }
 0x788   : > { %v2972_v25 = vpop.f32.mrf.mxu1 }
 0x789   : > { %v2973_v7 = vadd.f32 %v2972_v25, %v2815_v4  ;;  %v2980_v12 = vmax.f32 %v2969_v21, 0.0  ;;  %2987 = vst [vmem:[%s392_s29 + $0x10] sm:$0xff] %v2979_v24 }
 0x78a   : > { %v2974_v26 = vpop.f32.mrf.mxu1 }
 0x78b   : > { %v2983_v27 = vmax.f32 %v2973_v7, 0.0  ;;  %v2975_v28 = vadd.f32 %v2974_v26, %v2815_v4  ;;  %2988 = vst [vmem:[%s392_s29 + $0x18] sm:$0xff] %v2980_v12 }
 0x78d   : > { %2991 = vst [vmem:[%s392_s29 + $0x30] sm:$0xff] %v2983_v27  ;;  %v2984_v29 = vmax.f32 %v2975_v28, 0.0 }
 0x78f   : > { %2992 = vst [vmem:[%s392_s29 + $0x38] sm:$0xff] %v2984_v29 }
 0x790   : > { %3970 = shalt.err (!%p3967_p10)
}
 0x791   : > { %s3971_s28 = scalar_lea.hbm %s4354_s18, 1024  ;;  %s3975_s11 = scalar_lea.hbm %s4408_s10, 2048 }
 0x792   : > { %p3972_p7 = scmp.ne.s32.totalorder %s4354_s18, %s3971_s28  ;;  %p3976_p11 = scmp.lt.s32.totalorder %s4354_s18, %s4408_s10 }
 0x793   : > { %p3977_p0 = scmp.lt.s32.totalorder %s3975_s11, %s3971_s28 }
 0x794   : > { %p3973_p13 = pnand %p3972_p7, %p4421_p2 }
 0x795   : > { %p3978_p1 = por %p3977_p0, %p3976_p11 }
 0x796   : > { %p3974_p8 = pneg %p3973_p13 }
 0x798   : > { %p3979_p12 = pnand %p3978_p1, %p3974_p8 }
 0x79a   : > { %3982 = shalt.err (!%p3979_p12)
}
 0x79b   : > { %s4035_s17 = smov 512   ;;  %s4036_s26 = smov 32  }
 0x79c   : > { %3401 = dma.vmem_to_hbm [thread:$0]  (%p4421_p2), %s4349_s30, 1024, %s4354_s18, %s4358_s20, %s4035_s17, %s4035_s17, %s4036_s26  }
 0x79d PF: > { %p3423_p9 = scmp.ge.s32.totalorder %s4025_s16, 2  ;;  %s3022_s25 = sand.u32 1, %s4013_s13  }
 0x79e   : > { %p4422_p3 = scmp.ne.s32.totalorder %s4413_s24, 0  ;;  %s3023_s28 = scalar_lea.sflag [#allocation4], %s3022_s25 }
 0x7a0   : > { %p3414_p4 = pnand %p3423_p9, %p4422_p3 }
 0x7a2   : > { %p3415_p5 = pneg %p3414_p4 }
 0x7a4   : > { %4008 = dma.done.wait (%p3415_p5), %s3023_s28, 1024  }
 0x7a5   : > { %4010 = vsyncadd (%p3415_p5), %s3023_s28, 4294966272  ;;  %p22_p6 = scmp.ge.s32.totalorder %s4117_s19, 4   ;;  %s4423_s13 = smov %s4017_s14 }
 0x7a6   : > { %s4424_s14 = smov %s4021_s15  ;;  %s4425_s15 = smov %s4128_s22 }
 0x7a7   : > { %s4426_s16 = smov %s4117_s19  ;;  %24 = sbr.rel (!%p22_p6) target bundleno = 5 (0x5), region = 108 }
 0x7ac   :  { %3028 = vsyncpa [#allocation3], 1 }
 0x7ad   :  { %3030 = vsyncpa [#allocation3 + $0x1], 1 }
 0x7ae   :  { %3031 = vsyncpa [#allocation6], 1 }
 0x7af   :  { %3032 = vsyncpa [#allocation4], 1 }
 0x7b0   :  { %3034 = vsyncpa [#allocation4 + $0x1], 1 }

</bundles_post_ra>
